<compile_context>
chip_gen: v6e
topology: v6e:2x2x1
jax: 0.10.0
libtpu: 0.0.40
codegen_flags: <defaults>
</compile_context>

<pallas_src>
import functools

import jax
import jax.numpy as jnp
from jax.experimental import pallas as pl
from jax.experimental.pallas import tpu as pltpu


# Original / padded layer dims.
DIMS = [770, 500, 400, 200, 50, 3]
PAD_DIMS = [896, 512, 512, 256, 128, 128]


def _round_up(x, m):
    return (x + m - 1) // m * m


def soccernet_kernel(x_ref,
                     w1_ref, b1_ref,
                     w2_ref, b2_ref,
                     w3_ref, b3_ref,
                     w4_ref, b4_ref,
                     w5_ref, b5_ref,
                     o_ref):
    # x: (TB, 896) bf16; weights bf16; biases f32; output f32 (TB, 128).
    h = x_ref[...]

    # fc1 + ReLU
    h = jnp.dot(h, w1_ref[...], preferred_element_type=jnp.float32) + b1_ref[...]
    h = jnp.maximum(h, 0.0).astype(jnp.bfloat16)

    # fc2 + ReLU
    h = jnp.dot(h, w2_ref[...], preferred_element_type=jnp.float32) + b2_ref[...]
    h = jnp.maximum(h, 0.0).astype(jnp.bfloat16)

    # fc3 + ReLU
    h = jnp.dot(h, w3_ref[...], preferred_element_type=jnp.float32) + b3_ref[...]
    h = jnp.maximum(h, 0.0).astype(jnp.bfloat16)

    # fc4 + ReLU
    h = jnp.dot(h, w4_ref[...], preferred_element_type=jnp.float32) + b4_ref[...]
    h = jnp.maximum(h, 0.0).astype(jnp.bfloat16)

    # final fc (no activation)
    out = jnp.dot(h, w5_ref[...], preferred_element_type=jnp.float32) + b5_ref[...]
    o_ref[...] = out.astype(o_ref.dtype)


def _prepare_params(params):
    """Pad (in,out) weights / (1,out) biases to 128-multiples; weights -> bf16."""
    prepared = []
    for layer, (w, b) in enumerate(params):
        in_d, out_d = DIMS[layer], DIMS[layer + 1]
        in_p, out_p = PAD_DIMS[layer], PAD_DIMS[layer + 1]
        w_p = jnp.zeros((in_p, out_p), jnp.bfloat16).at[:in_d, :out_d].set(
            w.astype(jnp.bfloat16))
        b_p = jnp.zeros((1, out_p), jnp.float32).at[:, :out_d].set(
            b.astype(jnp.float32))
        prepared.extend([w_p, b_p])
    return prepared


@functools.partial(jax.jit, static_argnames=())
def soccernet_forward(x, params_flat):
    """x: (B, 770) f32.  params_flat: padded [w1,b1,...,w5,b5] from _prepare_params."""
    batch = x.shape[0]
    d_in, d_out = PAD_DIMS[0], PAD_DIMS[-1]

    # Batch tile: fill the MXU (128 rows) when possible; otherwise a sublane-aligned
    # tile covering the whole (small) batch.
    tb = 128 if batch >= 128 else max(8, _round_up(batch, 8))
    padded_b = _round_up(batch, tb)

    # Zero-pad batch + features, cast activations to bf16 for the MXU.
    x_p = jnp.zeros((padded_b, d_in), jnp.bfloat16)
    x_p = x_p.at[:batch, :DIMS[0]].set(x.astype(jnp.bfloat16))

    grid = (padded_b // tb,)

    # x tile marches with the grid; every weight/bias stays on block (0, 0)
    # -> VMEM-resident params, double-buffered x / out tiles.
    in_specs = [pl.BlockSpec((tb, d_in), lambda i: (i, 0))]
    for p in params_flat:
        in_specs.append(pl.BlockSpec(p.shape, lambda i: (0, 0)))
    out_spec = pl.BlockSpec((tb, d_out), lambda i: (i, 0))

    out_padded = pl.pallas_call(
        soccernet_kernel,
        out_shape=jax.ShapeDtypeStruct((padded_b, d_out), jnp.float32),
        grid=grid,
        in_specs=in_specs,
        out_specs=out_spec,
        compiler_params=pltpu.CompilerParams(
            dimension_semantics=("parallel",)),
    )(x_p, *params_flat)

    # Strip batch + lane padding (true output width is 3).
    return out_padded[:batch, :DIMS[-1]]


def init_params(key):
    """Deterministic init matching nn.Linear shapes, stored as (in, out) / (1, out)."""
    params = []
    for i in range(len(DIMS) - 1):
        fan_in, fan_out = DIMS[i], DIMS[i + 1]
        key, kw, kb = jax.random.split(key, 3)
        bound = 1.0 / (fan_in ** 0.5)  # PyTorch default uniform(-1/sqrt(fan_in), ...)
        w = jax.random.uniform(kw, (fan_in, fan_out), jnp.float32, -bound, bound)
        b = jax.random.uniform(kb, (1, fan_out), jnp.float32, -bound, bound)
        params.append((w, b))
    return params


if __name__ == "__main__":
    key = jax.random.PRNGKey(0)
    key, kx = jax.random.split(key)

    batch = 8
    x = jax.random.normal(kx, (batch, 770), dtype=jnp.float32)
    params = init_params(key)
    params_flat = _prepare_params(params)

    out = soccernet_forward(x, params_flat)
    out = jax.block_until_ready(out)

    # Reference in plain JAX using the same bf16-weight / f32-accumulate math.
    ref = x
    for i, (w, b) in enumerate(params):
        ref = jnp.dot(ref.astype(jnp.bfloat16), w.astype(jnp.bfloat16),
                      preferred_element_type=jnp.float32) + b
        if i < len(params) - 1:
            ref = jnp.maximum(ref, 0.0)

    assert out.shape == (batch, 3)
    assert jnp.allclose(out, ref, atol=2e-2, rtol=2e-2), (
        float(jnp.max(jnp.abs(out - ref))))

    print("KERNEL_OK")
</pallas_src>

<mosaic_0001>
module attributes {stable_mosaic.version = 11 : i64} {
  func.func @soccernet_kernel(%arg0: i32, %arg1: memref<8x896xbf16, #tpu.memory_space<vmem>>, %arg2: memref<896x512xbf16, #tpu.memory_space<vmem>>, %arg3: memref<1x512xf32, #tpu.memory_space<vmem>>, %arg4: memref<512x512xbf16, #tpu.memory_space<vmem>>, %arg5: memref<1x512xf32, #tpu.memory_space<vmem>>, %arg6: memref<512x256xbf16, #tpu.memory_space<vmem>>, %arg7: memref<1x256xf32, #tpu.memory_space<vmem>>, %arg8: memref<256x128xbf16, #tpu.memory_space<vmem>>, %arg9: memref<1x128xf32, #tpu.memory_space<vmem>>, %arg10: memref<128x128xbf16, #tpu.memory_space<vmem>>, %arg11: memref<1x128xf32, #tpu.memory_space<vmem>>, %arg12: memref<8x128xf32, #tpu.memory_space<vmem>>) attributes {dimension_semantics = [#tpu.dimension_semantics<parallel>], iteration_bounds = array<i64: 1>, scalar_prefetch = 0 : i64, scratch_operands = 0 : i64, tpu.core_type = #tpu.core_type<tc>, window_params = [{transform_indices = @transform_0, window_bounds = array<i64: 8, 896>}, {pipeline_mode = #tpu.pipeline_mode<synchronous>, transform_indices = @transform_1, window_bounds = array<i64: 896, 512>}, {pipeline_mode = #tpu.pipeline_mode<synchronous>, transform_indices = @transform_2, window_bounds = array<i64: 1, 512>}, {pipeline_mode = #tpu.pipeline_mode<synchronous>, transform_indices = @transform_3, window_bounds = array<i64: 512, 512>}, {pipeline_mode = #tpu.pipeline_mode<synchronous>, transform_indices = @transform_4, window_bounds = array<i64: 1, 512>}, {pipeline_mode = #tpu.pipeline_mode<synchronous>, transform_indices = @transform_5, window_bounds = array<i64: 512, 256>}, {pipeline_mode = #tpu.pipeline_mode<synchronous>, transform_indices = @transform_6, window_bounds = array<i64: 1, 256>}, {pipeline_mode = #tpu.pipeline_mode<synchronous>, transform_indices = @transform_7, window_bounds = array<i64: 256, 128>}, {pipeline_mode = #tpu.pipeline_mode<synchronous>, transform_indices = @transform_8, window_bounds = array<i64: 1, 128>}, {pipeline_mode = #tpu.pipeline_mode<synchronous>, transform_indices = @transform_9, window_bounds = array<i64: 128, 128>}, {pipeline_mode = #tpu.pipeline_mode<synchronous>, transform_indices = @transform_10, window_bounds = array<i64: 1, 128>}, {transform_indices = @transform_11, window_bounds = array<i64: 8, 128>}]} {
    %c0 = arith.constant 0 : index
    %c0_0 = arith.constant 0 : index
    %0 = vector.load %arg1[%c0, %c0_0] : memref<8x896xbf16, #tpu.memory_space<vmem>>, vector<8x896xbf16>
    %c0_1 = arith.constant 0 : index
    %c0_2 = arith.constant 0 : index
    %1 = vector.load %arg2[%c0_1, %c0_2] : memref<896x512xbf16, #tpu.memory_space<vmem>>, vector<896x512xbf16>
    %cst = arith.constant dense<0.000000e+00> : vector<8x512xf32>
    %2 = tpu.matmul %0, %1, %cst {dimension_numbers = #tpu.dot_dimension_numbers<[1], [0], [0], [1], [0, 0, 1, 1], [], []>} : vector<8x896xbf16>, vector<896x512xbf16>, vector<8x512xf32> -> vector<8x512xf32>
    %c0_3 = arith.constant 0 : index
    %c0_4 = arith.constant 0 : index
    %3 = vector.load %arg3[%c0_3, %c0_4] : memref<1x512xf32, #tpu.memory_space<vmem>>, vector<1x512xf32>
    %4 = vector.broadcast %3 : vector<1x512xf32> to vector<8x512xf32>
    %5 = arith.addf %2, %4 : vector<8x512xf32>
    %cst_5 = arith.constant 0.000000e+00 : f32
    %6 = vector.broadcast %cst_5 : f32 to vector<8x512xf32>
    %7 = arith.maximumf %5, %6 : vector<8x512xf32>
    %8 = arith.truncf %7 : vector<8x512xf32> to vector<8x512xbf16>
    %c0_6 = arith.constant 0 : index
    %c0_7 = arith.constant 0 : index
    %9 = vector.load %arg4[%c0_6, %c0_7] : memref<512x512xbf16, #tpu.memory_space<vmem>>, vector<512x512xbf16>
    %cst_8 = arith.constant dense<0.000000e+00> : vector<8x512xf32>
    %10 = tpu.matmul %8, %9, %cst_8 {dimension_numbers = #tpu.dot_dimension_numbers<[1], [0], [0], [1], [0, 0, 1, 1], [], []>} : vector<8x512xbf16>, vector<512x512xbf16>, vector<8x512xf32> -> vector<8x512xf32>
    %c0_9 = arith.constant 0 : index
    %c0_10 = arith.constant 0 : index
    %11 = vector.load %arg5[%c0_9, %c0_10] : memref<1x512xf32, #tpu.memory_space<vmem>>, vector<1x512xf32>
    %12 = vector.broadcast %11 : vector<1x512xf32> to vector<8x512xf32>
    %13 = arith.addf %10, %12 : vector<8x512xf32>
    %cst_11 = arith.constant 0.000000e+00 : f32
    %14 = vector.broadcast %cst_11 : f32 to vector<8x512xf32>
    %15 = arith.maximumf %13, %14 : vector<8x512xf32>
    %16 = arith.truncf %15 : vector<8x512xf32> to vector<8x512xbf16>
    %c0_12 = arith.constant 0 : index
    %c0_13 = arith.constant 0 : index
    %17 = vector.load %arg6[%c0_12, %c0_13] : memref<512x256xbf16, #tpu.memory_space<vmem>>, vector<512x256xbf16>
    %cst_14 = arith.constant dense<0.000000e+00> : vector<8x256xf32>
    %18 = tpu.matmul %16, %17, %cst_14 {dimension_numbers = #tpu.dot_dimension_numbers<[1], [0], [0], [1], [0, 0, 1, 1], [], []>} : vector<8x512xbf16>, vector<512x256xbf16>, vector<8x256xf32> -> vector<8x256xf32>
    %c0_15 = arith.constant 0 : index
    %c0_16 = arith.constant 0 : index
    %19 = vector.load %arg7[%c0_15, %c0_16] : memref<1x256xf32, #tpu.memory_space<vmem>>, vector<1x256xf32>
    %20 = vector.broadcast %19 : vector<1x256xf32> to vector<8x256xf32>
    %21 = arith.addf %18, %20 : vector<8x256xf32>
    %cst_17 = arith.constant 0.000000e+00 : f32
    %22 = vector.broadcast %cst_17 : f32 to vector<8x256xf32>
    %23 = arith.maximumf %21, %22 : vector<8x256xf32>
    %24 = arith.truncf %23 : vector<8x256xf32> to vector<8x256xbf16>
    %c0_18 = arith.constant 0 : index
    %c0_19 = arith.constant 0 : index
    %25 = vector.load %arg8[%c0_18, %c0_19] : memref<256x128xbf16, #tpu.memory_space<vmem>>, vector<256x128xbf16>
    %cst_20 = arith.constant dense<0.000000e+00> : vector<8x128xf32>
    %26 = tpu.matmul %24, %25, %cst_20 {dimension_numbers = #tpu.dot_dimension_numbers<[1], [0], [0], [1], [0, 0, 1, 1], [], []>} : vector<8x256xbf16>, vector<256x128xbf16>, vector<8x128xf32> -> vector<8x128xf32>
    %c0_21 = arith.constant 0 : index
    %c0_22 = arith.constant 0 : index
    %27 = vector.load %arg9[%c0_21, %c0_22] : memref<1x128xf32, #tpu.memory_space<vmem>>, vector<1x128xf32>
    %28 = vector.broadcast %27 : vector<1x128xf32> to vector<8x128xf32>
    %29 = arith.addf %26, %28 : vector<8x128xf32>
    %cst_23 = arith.constant 0.000000e+00 : f32
    %30 = vector.broadcast %cst_23 : f32 to vector<8x128xf32>
    %31 = arith.maximumf %29, %30 : vector<8x128xf32>
    %32 = arith.truncf %31 : vector<8x128xf32> to vector<8x128xbf16>
    %c0_24 = arith.constant 0 : index
    %c0_25 = arith.constant 0 : index
    %33 = vector.load %arg10[%c0_24, %c0_25] : memref<128x128xbf16, #tpu.memory_space<vmem>>, vector<128x128xbf16>
    %cst_26 = arith.constant dense<0.000000e+00> : vector<8x128xf32>
    %34 = tpu.matmul %32, %33, %cst_26 {dimension_numbers = #tpu.dot_dimension_numbers<[1], [0], [0], [1], [0, 0, 1, 1], [], []>} : vector<8x128xbf16>, vector<128x128xbf16>, vector<8x128xf32> -> vector<8x128xf32>
    %c0_27 = arith.constant 0 : index
    %c0_28 = arith.constant 0 : index
    %35 = vector.load %arg11[%c0_27, %c0_28] : memref<1x128xf32, #tpu.memory_space<vmem>>, vector<1x128xf32>
    %36 = vector.broadcast %35 : vector<1x128xf32> to vector<8x128xf32>
    %37 = arith.addf %34, %36 : vector<8x128xf32>
    %c0_29 = arith.constant 0 : index
    %c0_30 = arith.constant 0 : index
    %38 = vector.load %arg12[%c0_29, %c0_30] : memref<8x128xf32, #tpu.memory_space<vmem>>, vector<8x128xf32>
    tpu.vector_store %arg12[%c0_29, %c0_30], %37 {strides = array<i32>} : memref<8x128xf32, #tpu.memory_space<vmem>>, vector<8x128xf32>,
    return
  }
  func.func @transform_0(%arg0: i32) -> (i32, i32) {
    %c0_i32 = arith.constant 0 : i32
    %c0_i32_0 = arith.constant 0 : i32
    return %arg0, %c0_i32 : i32, i32
  }
  func.func @transform_1(%arg0: i32) -> (i32, i32) {
    %c0_i32 = arith.constant 0 : i32
    %c0_i32_0 = arith.constant 0 : i32
    %c0_i32_1 = arith.constant 0 : i32
    return %c0_i32, %c0_i32_0 : i32, i32
  }
  func.func @transform_2(%arg0: i32) -> (i32, i32) {
    %c0_i32 = arith.constant 0 : i32
    %c0_i32_0 = arith.constant 0 : i32
    %c0_i32_1 = arith.constant 0 : i32
    return %c0_i32, %c0_i32_0 : i32, i32
  }
  func.func @transform_3(%arg0: i32) -> (i32, i32) {
    %c0_i32 = arith.constant 0 : i32
    %c0_i32_0 = arith.constant 0 : i32
    %c0_i32_1 = arith.constant 0 : i32
    return %c0_i32, %c0_i32_0 : i32, i32
  }
  func.func @transform_4(%arg0: i32) -> (i32, i32) {
    %c0_i32 = arith.constant 0 : i32
    %c0_i32_0 = arith.constant 0 : i32
    %c0_i32_1 = arith.constant 0 : i32
    return %c0_i32, %c0_i32_0 : i32, i32
  }
  func.func @transform_5(%arg0: i32) -> (i32, i32) {
    %c0_i32 = arith.constant 0 : i32
    %c0_i32_0 = arith.constant 0 : i32
    %c0_i32_1 = arith.constant 0 : i32
    return %c0_i32, %c0_i32_0 : i32, i32
  }
  func.func @transform_6(%arg0: i32) -> (i32, i32) {
    %c0_i32 = arith.constant 0 : i32
    %c0_i32_0 = arith.constant 0 : i32
    %c0_i32_1 = arith.constant 0 : i32
    return %c0_i32, %c0_i32_0 : i32, i32
  }
  func.func @transform_7(%arg0: i32) -> (i32, i32) {
    %c0_i32 = arith.constant 0 : i32
    %c0_i32_0 = arith.constant 0 : i32
    %c0_i32_1 = arith.constant 0 : i32
    return %c0_i32, %c0_i32_0 : i32, i32
  }
  func.func @transform_8(%arg0: i32) -> (i32, i32) {
    %c0_i32 = arith.constant 0 : i32
    %c0_i32_0 = arith.constant 0 : i32
    %c0_i32_1 = arith.constant 0 : i32
    return %c0_i32, %c0_i32_0 : i32, i32
  }
  func.func @transform_9(%arg0: i32) -> (i32, i32) {
    %c0_i32 = arith.constant 0 : i32
    %c0_i32_0 = arith.constant 0 : i32
    %c0_i32_1 = arith.constant 0 : i32
    return %c0_i32, %c0_i32_0 : i32, i32
  }
  func.func @transform_10(%arg0: i32) -> (i32, i32) {
    %c0_i32 = arith.constant 0 : i32
    %c0_i32_0 = arith.constant 0 : i32
    %c0_i32_1 = arith.constant 0 : i32
    return %c0_i32, %c0_i32_0 : i32, i32
  }
  func.func @transform_11(%arg0: i32) -> (i32, i32) {
    %c0_i32 = arith.constant 0 : i32
    %c0_i32_0 = arith.constant 0 : i32
    return %arg0, %c0_i32 : i32, i32
  }
}

</mosaic_0001>

<bundles_post_ra>
// kernel: soccernet_forward.1
= control target key start
LH: loop header
LB: loop body
LE: loop exit
PB: predicated region body
PF: predicated region fallthrough
CT: control target
= control target key end

     0   :  { %16 = vsyncpa [#allocation3], 0  ;;  %s5074_s0 = inlined_call_operand.vmem [shape: bf16[8,896], index: 0, kind: input, shape index: {}]   ;;  %s5075_s1 = inlined_call_operand.hbm [shape: bf16[896,512], index: 1, kind: input, shape index: {}]   ;;  %s5076_s2 = inlined_call_operand.vmem [shape: f32[1,512], index: 2, kind: input, shape index: {}]   ;;  %s5077_s3 = inlined_call_operand.hbm [shape: bf16[512,512], index: 3, kind: input, shape index: {}]   ;;  %s5078_s4 = inlined_call_operand.vmem [shape: f32[1,512], index: 4, kind: input, shape index: {}]   ;;  %s5079_s5 = inlined_call_operand.hbm [shape: bf16[512,256], index: 5, kind: input, shape index: {}]   ;;  %s5080_s6 = inlined_call_operand.vmem [shape: f32[1,256], index: 6, kind: input, shape index: {}]   ;;  %s5081_s7 = inlined_call_operand.vmem [shape: bf16[256,128], index: 7, kind: input, shape index: {}]   ;;  %s5082_s8 = inlined_call_operand.vmem [shape: f32[1,128], index: 8, kind: input, shape index: {}]   ;;  %s5083_s9 = inlined_call_operand.hbm [shape: bf16[128,128], index: 9, kind: input, shape index: {}]   ;;  %s5084_s10 = inlined_call_operand.vmem [shape: f32[1,128], index: 10, kind: input, shape index: {}]   ;;  %s5085_s11 = inlined_call_operand.vmem [shape: f32[8,128], index: 11, kind: output, shape index: {}]  }
   0x1   :  { %17 = vsyncpa [#allocation5], 0 }
   0x2   :  { %18 = vsyncpa [#allocation8], 0  ;;  %s4820_s17 = smov [#allocation4]   ;;  %s4821_s19 = smov [#allocation2]  }
   0x3   :  { %s40_s18 = sshll.u32 %s4820_s17, 4  ;;  %s26_s20 = sshll.u32 %s4821_s19, 4  ;;  %s41_s18 = int_to_ptr.vmem [resolvable:$true] %s40_s18  ;;  %s27_s20 = int_to_ptr.vmem [resolvable:$true] %s26_s20 }
   0x4   :  { %s4742_s21 = scalar_lea.vmem %s41_s18, 16384  ;;  %p4747_p1 = scmp.lt.s32.totalorder %s41_s18, %s41_s18 }
   0x5   :  { %p4743_p0 = scmp.ne.s32.totalorder %s41_s18, %s4742_s21  ;;  %p4748_p2 = scmp.lt.s32.totalorder %s4742_s21, %s4742_s21 }
   0x7   :  { %p4749_p3 = por %p4748_p2, %p4747_p1 }
   0x9   :  { %p4750_p4 = pnand %p4749_p3, %p4743_p0 }
   0xb   :  { %4753 = shalt.err (!%p4750_p4)
}
   0xc   :  { %s4822_s22 = smov 256   ;;  %s4823_s23 = smov 16  }
   0xd   :  { %46 = dma.hbm_to_vmem [thread:$0]  %s5077_s3, 16384, %s41_s18, [#allocation5], %s4822_s22, %s4822_s22, %s4823_s23  }
   0xe   :  { %s4762_s26 = scalar_lea.vmem %s27_s20, 28672  ;;  %p4767_p6 = scmp.lt.s32.totalorder %s27_s20, %s27_s20 }
   0xf   :  { %p4763_p5 = scmp.ne.s32.totalorder %s27_s20, %s4762_s26  ;;  %p4768_p7 = scmp.lt.s32.totalorder %s4762_s26, %s4762_s26 }
  0x11   :  { %p4769_p8 = por %p4768_p7, %p4767_p6 }
  0x13   :  { %p4770_p9 = pnand %p4769_p8, %p4763_p5 }
  0x15   :  { %4773 = shalt.err (!%p4770_p9)
}
  0x16   :  { %32 = dma.hbm_to_vmem [thread:$0]  %s5075_s1, 28672, %s27_s20, [#allocation3], %s4822_s22, %s4822_s22, %s4823_s23  }
  0x17   :  { %s4824_s29 = smov [#allocation6]  }
  0x18   :  { %s54_s30 = sshll.u32 %s4824_s29, 4  ;;  %s55_s30 = int_to_ptr.vmem [resolvable:$true] %s54_s30 }
  0x19   :  { %s4782_s12 = scalar_lea.vmem %s55_s30, 8192  ;;  %p4787_p11 = scmp.lt.s32.totalorder %s55_s30, %s55_s30 }
  0x1a   :  { %p4783_p10 = scmp.ne.s32.totalorder %s55_s30, %s4782_s12  ;;  %p4788_p12 = scmp.lt.s32.totalorder %s4782_s12, %s4782_s12 }
  0x1c   :  { %p4789_p13 = por %p4788_p12, %p4787_p11 }
  0x1e   :  { %p4790_p0 = pnand %p4789_p13, %p4783_p10 }
  0x20   :  { %4793 = shalt.err (!%p4790_p0)
}
  0x21   :  { %s4825_s3 = smov 128   ;;  %s4826_s13 = smov 8  }
  0x22   :  { %60 = dma.hbm_to_vmem [thread:$0]  %s5079_s5, 8192, %s55_s30, [#allocation5], %s4825_s3, %s4825_s3, %s4826_s13  }
  0x23   :  { %s4827_s16 = smov [#allocation7]  }
  0x24   :  { %s72_s17 = sshll.u32 %s4827_s16, 4  ;;  %s73_s17 = int_to_ptr.vmem [resolvable:$true] %s72_s17 }
  0x25   :  { %s4802_s1 = scalar_lea.vmem %s73_s17, 1024  ;;  %p4807_p2 = scmp.lt.s32.totalorder %s73_s17, %s73_s17 }
  0x26   :  { %p4803_p1 = scmp.ne.s32.totalorder %s73_s17, %s4802_s1  ;;  %p4808_p3 = scmp.lt.s32.totalorder %s4802_s1, %s4802_s1 }
  0x28   :  { %p4809_p4 = por %p4808_p3, %p4807_p2 }
  0x2a   :  { %p4810_p5 = pnand %p4809_p4, %p4803_p1 }
  0x2c   :  { %4813 = shalt.err (!%p4810_p5)
}
  0x2d   :  { %s4828_s18 = smov 64   ;;  %s4829_s19 = smov 4  }
  0x2e   :  { %78 = dma.hbm_to_vmem [thread:$0]  %s5083_s9, 1024, %s73_s17, [#allocation8], %s4828_s18, %s4828_s18, %s4829_s19  }
  0x2f   :  { %4814 = dma.done.wait [#allocation3], 28672  }
  0x30   :  { %4815 = vsyncadd [#allocation3], 4294938624 }
  0x31   :  { %4816 = dma.done.wait [#allocation5], 24576  }
  0x32   :  { %4817 = vsyncadd [#allocation5], 4294942720 }
  0x33   :  { %4818 = dma.done.wait [#allocation8], 1024  }
  0x34   :  { %4819 = vsyncadd [#allocation8], 4294966272  ;;  %v4078_v0 = vld [vmem:[#allocation2 + $0xe4] ss:$16 sps:$4 sm:$0xff]   ;;  %v4082_v2 = vld [vmem:[#allocation2 + $0xe0] ss:$16 sps:$4 sm:$0xff]  }
  0x35   :  { %v4080_v1 = vld [vmem:[#allocation2 + $0x2e4] ss:$16 sps:$4 sm:$0xff]   ;;  %1489 = vmatprep.subr.bf16.mxu0 %v4078_v0  ;;  %v4083_v3 = vld [vmem:[#allocation2 + $0x2e0] ss:$16 sps:$4 sm:$0xff]   ;;  %v95_v48 = vld [vmem:[%s5074_s0 + $0x8] sm:$0xff]  ;;  %vm4832_vm0 = vmmov 0  }
  0x36   :  { %1530 = vmatprep.subr.bf16.mxu1 %v4080_v1  ;;  %v4084_v4 = vld [vmem:[#allocation2 + $0xc4] ss:$16 sps:$4 sm:$0xff]   ;;  %1490 = vmatpush1.bf16.msra.mxu0 %v4082_v2  ;;  %v4088_v6 = vld [vmem:[#allocation2 + $0xc0] ss:$16 sps:$4 sm:$0xff]   ;;  %v4913_v51 = vcombine.high %v95_v48, %v95_v48 }
  0x37   :  { %1531 = vmatpush1.bf16.msra.mxu1 %v4083_v3  ;;  %v4086_v5 = vld [vmem:[#allocation2 + $0x2c4] ss:$16 sps:$4 sm:$0xff]   ;;  %1491 = vmatprep.subr.bf16.mxu0 %v4084_v4  ;;  %v4089_v7 = vld [vmem:[#allocation2 + $0x2c0] ss:$16 sps:$4 sm:$0xff]  }
  0x38   :  { %1532 = vmatprep.subr.bf16.mxu1 %v4086_v5  ;;  %v4090_v8 = vld [vmem:[#allocation2 + $0xa4] ss:$16 sps:$4 sm:$0xff]   ;;  %v4094_v10 = vld [vmem:[#allocation2 + $0xa0] ss:$16 sps:$4 sm:$0xff]   ;;  %1562 = vmatprep.mubr.bf16.mxu1 %v4913_v51 }
  0x39   :  { %v4092_v9 = vld [vmem:[#allocation2 + $0x2a4] ss:$16 sps:$4 sm:$0xff]   ;;  %v4095_v11 = vld [vmem:[#allocation2 + $0x2a0] ss:$16 sps:$4 sm:$0xff]  }
  0x3a   :  { %1492 = vmatpush1.bf16.msra.mxu0 %v4088_v6  ;;  %v4096_v12 = vld [vmem:[#allocation2 + $0x84] ss:$16 sps:$4 sm:$0xff]   ;;  %v4100_v14 = vld [vmem:[#allocation2 + $0x80] ss:$16 sps:$4 sm:$0xff]  }
  0x3b   :  { %1533 = vmatpush1.bf16.msra.mxu1 %v4089_v7  ;;  %1493 = vmatprep.subr.bf16.mxu0 %v4090_v8  ;;  %v4098_v13 = vld [vmem:[#allocation2 + $0x284] ss:$16 sps:$4 sm:$0xff]   ;;  %v4101_v15 = vld [vmem:[#allocation2 + $0x280] ss:$16 sps:$4 sm:$0xff]   ;;  %v4919_v7 = vcombine.low %v95_v48, %v95_v48  ;;  %v4238_v48 = vld [vmem:[#allocation2 + $0xcc] ss:$16 sps:$4 sm:$0xff]  }
  0x3c   :  { %1534 = vmatprep.subr.bf16.mxu1 %v4092_v9  ;;  %v4102_v16 = vld [vmem:[#allocation2 + $0x64] ss:$16 sps:$4 sm:$0xff]   ;;  %v4106_v18 = vld [vmem:[#allocation2 + $0x60] ss:$16 sps:$4 sm:$0xff]  }
  0x3d   :  { %v4104_v17 = vld [vmem:[#allocation2 + $0x264] ss:$16 sps:$4 sm:$0xff]   ;;  %v4107_v19 = vld [vmem:[#allocation2 + $0x260] ss:$16 sps:$4 sm:$0xff]  }
  0x3e   :  { %1494 = vmatpush1.bf16.msra.mxu0 %v4094_v10  ;;  %v4108_v20 = vld [vmem:[#allocation2 + $0x44] ss:$16 sps:$4 sm:$0xff]   ;;  %v4112_v22 = vld [vmem:[#allocation2 + $0x40] ss:$16 sps:$4 sm:$0xff]  }
  0x3f   :  { %1535 = vmatpush1.bf16.msra.mxu1 %v4095_v11  ;;  %1495 = vmatprep.subr.bf16.mxu0 %v4096_v12  ;;  %v4110_v21 = vld [vmem:[#allocation2 + $0x244] ss:$16 sps:$4 sm:$0xff]   ;;  %v4113_v23 = vld [vmem:[#allocation2 + $0x240] ss:$16 sps:$4 sm:$0xff]  }
  0x40   :  { %1536 = vmatprep.subr.bf16.mxu1 %v4098_v13  ;;  %v4114_v24 = vld [vmem:[#allocation2 + $0x24] ss:$16 sps:$4 sm:$0xff]   ;;  %v4118_v26 = vld [vmem:[#allocation2 + $0x20] ss:$16 sps:$4 sm:$0xff]  }
  0x41   :  { %v4116_v25 = vld [vmem:[#allocation2 + $0x224] ss:$16 sps:$4 sm:$0xff]   ;;  %v4119_v27 = vld [vmem:[#allocation2 + $0x220] ss:$16 sps:$4 sm:$0xff]  }
  0x42   :  { %1496 = vmatpush1.bf16.msra.mxu0 %v4100_v14  ;;  %v4120_v28 = vld [vmem:[#allocation2 + $0x4] ss:$16 sps:$4 sm:$0xff]   ;;  %v4124_v30 = vld [vmem:[#allocation2] ss:$16 sps:$4 sm:$0xff]  }
  0x43   :  { %1537 = vmatpush1.bf16.msra.mxu1 %v4101_v15  ;;  %1497 = vmatprep.subr.bf16.mxu0 %v4102_v16  ;;  %v4122_v29 = vld [vmem:[#allocation2 + $0x204] ss:$16 sps:$4 sm:$0xff]   ;;  %v4125_v31 = vld [vmem:[#allocation2 + $0x200] ss:$16 sps:$4 sm:$0xff]   ;;  %v4830_v16 = vmov 0  }
  0x44   :  { %1538 = vmatprep.subr.bf16.mxu1 %v4104_v17  ;;  %v4126_v32 = vld [vmem:[#allocation2 + $0x1e4] ss:$16 sps:$4 sm:$0xff]   ;;  %v4130_v34 = vld [vmem:[#allocation2 + $0x1e0] ss:$16 sps:$4 sm:$0xff]  }
  0x45   :  { %v4128_v33 = vld [vmem:[#allocation2 + $0x3e4] ss:$16 sps:$4 sm:$0xff]   ;;  %v4131_v35 = vld [vmem:[#allocation2 + $0x3e0] ss:$16 sps:$4 sm:$0xff]  }
  0x46   :  { %1498 = vmatpush1.bf16.msra.mxu0 %v4106_v18  ;;  %v4132_v36 = vld [vmem:[#allocation2 + $0x1c4] ss:$16 sps:$4 sm:$0xff]   ;;  %v4136_v38 = vld [vmem:[#allocation2 + $0x1c0] ss:$16 sps:$4 sm:$0xff]  }
  0x47   :  { %1539 = vmatpush1.bf16.msra.mxu1 %v4107_v19  ;;  %1499 = vmatprep.subr.bf16.mxu0 %v4108_v20  ;;  %v4134_v37 = vld [vmem:[#allocation2 + $0x3c4] ss:$16 sps:$4 sm:$0xff]   ;;  %v4137_v39 = vld [vmem:[#allocation2 + $0x3c0] ss:$16 sps:$4 sm:$0xff]  }
  0x48   :  { %1540 = vmatprep.subr.bf16.mxu1 %v4110_v21  ;;  %v4138_v40 = vld [vmem:[#allocation2 + $0x1a4] ss:$16 sps:$4 sm:$0xff]   ;;  %v4142_v42 = vld [vmem:[#allocation2 + $0x1a0] ss:$16 sps:$4 sm:$0xff]  }
  0x49   :  { %v4140_v41 = vld [vmem:[#allocation2 + $0x3a4] ss:$16 sps:$4 sm:$0xff]   ;;  %v4143_v43 = vld [vmem:[#allocation2 + $0x3a0] ss:$16 sps:$4 sm:$0xff]  }
  0x4a   :  { %1500 = vmatpush1.bf16.msra.mxu0 %v4112_v22  ;;  %v4144_v44 = vld [vmem:[#allocation2 + $0x184] ss:$16 sps:$4 sm:$0xff]   ;;  %v4148_v49 = vld [vmem:[#allocation2 + $0x180] ss:$16 sps:$4 sm:$0xff]  }
  0x4b   :  { %1541 = vmatpush1.bf16.msra.mxu1 %v4113_v23  ;;  %1501 = vmatprep.subr.bf16.mxu0 %v4114_v24  ;;  %v4146_v45 = vld [vmem:[#allocation2 + $0x384] ss:$16 sps:$4 sm:$0xff]   ;;  %v4149_v50 = vld [vmem:[#allocation2 + $0x380] ss:$16 sps:$4 sm:$0xff]  }
  0x4c   :  { %1542 = vmatprep.subr.bf16.mxu1 %v4116_v25  ;;  %v94_v46 = vld [vmem:[%s5074_s0] sm:$0xff] }
  0x4d   :  { %v4908_v47 = vcombine.high %v94_v46, %v94_v46  ;;  %v4150_v52 = vld [vmem:[#allocation2 + $0x164] ss:$16 sps:$4 sm:$0xff]   ;;  %v4154_v54 = vld [vmem:[#allocation2 + $0x160] ss:$16 sps:$4 sm:$0xff]   ;;  %v4917_v6 = vcombine.low %v94_v46, %v94_v46 }
  0x4e   :  { %1502 = vmatpush1.bf16.msra.mxu0 %v4118_v26  ;;  %v4152_v53 = vld [vmem:[#allocation2 + $0x364] ss:$16 sps:$4 sm:$0xff]   ;;  %v4155_v55 = vld [vmem:[#allocation2 + $0x360] ss:$16 sps:$4 sm:$0xff]  }
  0x4f   :  { %1543 = vmatpush1.bf16.msra.mxu1 %v4119_v27  ;;  %1503 = vmatprep.subr.bf16.mxu0 %v4120_v28  ;;  %v4156_v56 = vld [vmem:[#allocation2 + $0x144] ss:$16 sps:$4 sm:$0xff]   ;;  %v4160_v58 = vld [vmem:[#allocation2 + $0x140] ss:$16 sps:$4 sm:$0xff]  }
  0x50   :  { %1544 = vmatprep.subr.bf16.mxu1 %v4122_v29  ;;  %1521 = vmatprep.mubr.bf16.mxu0 %v4908_v47  ;;  %v4158_v57 = vld [vmem:[#allocation2 + $0x344] ss:$16 sps:$4 sm:$0xff]   ;;  %v4161_v59 = vld [vmem:[#allocation2 + $0x340] ss:$16 sps:$4 sm:$0xff]  }
  0x51   :  { %v4162_v60 = vld [vmem:[#allocation2 + $0x124] ss:$16 sps:$4 sm:$0xff]   ;;  %v4166_v62 = vld [vmem:[#allocation2 + $0x120] ss:$16 sps:$4 sm:$0xff]  }
  0x52   :  { %1504 = vmatpush1.bf16.msra.mxu0 %v4124_v30  ;;  %v4164_v61 = vld [vmem:[#allocation2 + $0x324] ss:$16 sps:$4 sm:$0xff]   ;;  %v4167_v63 = vld [vmem:[#allocation2 + $0x320] ss:$16 sps:$4 sm:$0xff]  }
  0x53   :  { %1545 = vmatpush1.bf16.msra.mxu1 %v4125_v31  ;;  %1505 = vmatprep.subr.bf16.mxu0 %v4126_v32  ;;  %v4168_v0 = vld [vmem:[#allocation2 + $0x104] ss:$16 sps:$4 sm:$0xff]   ;;  %v4172_v2 = vld [vmem:[#allocation2 + $0x100] ss:$16 sps:$4 sm:$0xff]  }
  0x54   :  { %1546 = vmatprep.subr.bf16.mxu1 %v4128_v33  ;;  %v4170_v1 = vld [vmem:[#allocation2 + $0x304] ss:$16 sps:$4 sm:$0xff]   ;;  %v4173_v3 = vld [vmem:[#allocation2 + $0x300] ss:$16 sps:$4 sm:$0xff]  }
  0x55   :  { %v4180_v4 = vld [vmem:[#allocation2 + $0x4e4] ss:$16 sps:$4 sm:$0xff]   ;;  %v4178_v8 = vld [vmem:[#allocation2 + $0x4e0] ss:$16 sps:$4 sm:$0xff]  }
  0x56   :  { %1506 = vmatpush2.bf16.msra.mxu0 %v4130_v34  ;;  %v4183_v5 = vld [vmem:[#allocation2 + $0x6e4] ss:$16 sps:$4 sm:$0xff]   ;;  %v4181_v9 = vld [vmem:[#allocation2 + $0x6e0] ss:$16 sps:$4 sm:$0xff]  }
  0x57   :  { %1547 = vmatpush2.bf16.msra.mxu1 %v4131_v35  ;;  %1507 = vmatprep.subr.bf16.mxu0 %v4132_v36  ;;  %v4186_v10 = vld [vmem:[#allocation2 + $0x4c4] ss:$16 sps:$4 sm:$0xff]   ;;  %v4184_v12 = vld [vmem:[#allocation2 + $0x4c0] ss:$16 sps:$4 sm:$0xff]  }
  0x58   :  { %1548 = vmatprep.subr.bf16.mxu1 %v4134_v37  ;;  %v4189_v11 = vld [vmem:[#allocation2 + $0x6c4] ss:$16 sps:$4 sm:$0xff]   ;;  %v4187_v13 = vld [vmem:[#allocation2 + $0x6c0] ss:$16 sps:$4 sm:$0xff]  }
  0x59   :  { %v4192_v14 = vld [vmem:[#allocation2 + $0x4a4] ss:$16 sps:$4 sm:$0xff]   ;;  %v4190_v17 = vld [vmem:[#allocation2 + $0x4a0] ss:$16 sps:$4 sm:$0xff]  }
  0x5a   :  { %1508 = vmatpush2.bf16.msra.mxu0 %v4136_v38  ;;  %v4195_v15 = vld [vmem:[#allocation2 + $0x6a4] ss:$16 sps:$4 sm:$0xff]   ;;  %v4193_v18 = vld [vmem:[#allocation2 + $0x6a0] ss:$16 sps:$4 sm:$0xff]  }
  0x5b   :  { %1549 = vmatpush2.bf16.msra.mxu1 %v4137_v39  ;;  %1509 = vmatprep.subr.bf16.mxu0 %v4138_v40  ;;  %v4198_v19 = vld [vmem:[#allocation2 + $0x484] ss:$16 sps:$4 sm:$0xff]   ;;  %v4196_v21 = vld [vmem:[#allocation2 + $0x480] ss:$16 sps:$4 sm:$0xff]  }
  0x5c   :  { %1550 = vmatprep.subr.bf16.mxu1 %v4140_v41  ;;  %v4201_v20 = vld [vmem:[#allocation2 + $0x684] ss:$16 sps:$4 sm:$0xff]   ;;  %v4199_v22 = vld [vmem:[#allocation2 + $0x680] ss:$16 sps:$4 sm:$0xff]  }
  0x5d   :  { %v4204_v23 = vld [vmem:[#allocation2 + $0x464] ss:$16 sps:$4 sm:$0xff]   ;;  %v4202_v25 = vld [vmem:[#allocation2 + $0x460] ss:$16 sps:$4 sm:$0xff]  }
  0x5e   :  { %1510 = vmatpush2.bf16.msra.mxu0 %v4142_v42  ;;  %v4207_v24 = vld [vmem:[#allocation2 + $0x664] ss:$16 sps:$4 sm:$0xff]   ;;  %v4205_v26 = vld [vmem:[#allocation2 + $0x660] ss:$16 sps:$4 sm:$0xff]   ;;  %v4232_v42 = vld [vmem:[#allocation2 + $0xec] ss:$16 sps:$4 sm:$0xff]  }
  0x5f   :  { %1551 = vmatpush2.bf16.msra.mxu1 %v4143_v43  ;;  %1511 = vmatprep.subr.bf16.mxu0 %v4144_v44  ;;  %v4210_v27 = vld [vmem:[#allocation2 + $0x444] ss:$16 sps:$4 sm:$0xff]   ;;  %v4208_v29 = vld [vmem:[#allocation2 + $0x440] ss:$16 sps:$4 sm:$0xff]   ;;  %v4229_v44 = vld [vmem:[%s5074_s0 + $0x18] ss:$0 sps:$4 sm:$0xff]  }
  0x60   :  { %1552 = vmatprep.subr.bf16.mxu1 %v4146_v45  ;;  %v4213_v28 = vld [vmem:[#allocation2 + $0x644] ss:$16 sps:$4 sm:$0xff]   ;;  %v4211_v30 = vld [vmem:[#allocation2 + $0x640] ss:$16 sps:$4 sm:$0xff]   ;;  %v4230_v45 = vld [vmem:[#allocation2 + $0xe8] ss:$16 sps:$4 sm:$0xff]  }
  0x61   :  { %v4216_v31 = vld [vmem:[#allocation2 + $0x424] ss:$16 sps:$4 sm:$0xff]   ;;  %v4214_v34 = vld [vmem:[#allocation2 + $0x420] ss:$16 sps:$4 sm:$0xff]  }
  0x62   :  { %1512 = vmatpush2.bf16.msra.mxu0 %v4148_v49  ;;  %v4219_v32 = vld [vmem:[#allocation2 + $0x624] ss:$16 sps:$4 sm:$0xff]   ;;  %v4217_v36 = vld [vmem:[#allocation2 + $0x620] ss:$16 sps:$4 sm:$0xff]  }
  0x63   :  { %1553 = vmatpush2.bf16.msra.mxu1 %v4149_v50  ;;  %1513 = vmatprep.subr.bf16.mxu0 %v4150_v52  ;;  %v4927_v33 = vld [vmem:[%s5074_s0 + $0x10] sm:$0xff]  ;;  %v4236_v50 = vld [vmem:[#allocation2 + $0xc8] ss:$16 sps:$4 sm:$0xff]  }
  0x64   :  { %1554 = vmatprep.subr.bf16.mxu1 %v4152_v53  ;;  %v4931_v35 = vcombine.high %v4927_v33, %v4927_v33  ;;  %v4222_v37 = vld [vmem:[#allocation2 + $0x404] ss:$16 sps:$4 sm:$0xff]   ;;  %v4220_v39 = vld [vmem:[#allocation2 + $0x400] ss:$16 sps:$4 sm:$0xff]   ;;  %v4244_v53 = vld [vmem:[#allocation2 + $0xac] ss:$16 sps:$4 sm:$0xff]  }
  0x65   :  { %v4225_v38 = vld [vmem:[#allocation2 + $0x604] ss:$16 sps:$4 sm:$0xff]   ;;  %v4223_v40 = vld [vmem:[#allocation2 + $0x600] ss:$16 sps:$4 sm:$0xff]  }
  0x66   :  { %1514 = vmatpush2.bf16.msra.mxu0 %v4154_v54  ;;  %v4228_v41 = vld [vmem:[#allocation2 + $0x5e4] ss:$16 sps:$4 sm:$0xff]   ;;  %v4226_v43 = vld [vmem:[#allocation2 + $0x5e0] ss:$16 sps:$4 sm:$0xff]  }
  0x67   :  { %1555 = vmatpush2.bf16.msra.mxu1 %v4155_v55  ;;  %1515 = vmatprep.subr.bf16.mxu0 %v4156_v56  ;;  %v4235_v46 = vld [vmem:[#allocation2 + $0x5c4] ss:$16 sps:$4 sm:$0xff]   ;;  %v4233_v49 = vld [vmem:[#allocation2 + $0x5c0] ss:$16 sps:$4 sm:$0xff]   ;;  %v4242_v55 = vld [vmem:[#allocation2 + $0xa8] ss:$16 sps:$4 sm:$0xff]  }
  0x68   :  { %1556 = vmatprep.subr.bf16.mxu1 %v4158_v57  ;;  %v4241_v52 = vld [vmem:[#allocation2 + $0x5a4] ss:$16 sps:$4 sm:$0xff]   ;;  %v4239_v54 = vld [vmem:[#allocation2 + $0x5a0] ss:$16 sps:$4 sm:$0xff]   ;;  %v4250_v57 = vld [vmem:[#allocation2 + $0x8c] ss:$16 sps:$4 sm:$0xff]  }
  0x69   :  { %v4247_v56 = vld [vmem:[#allocation2 + $0x584] ss:$16 sps:$4 sm:$0xff]  }
  0x6a   :  { %1516 = vmatpush2.bf16.msra.mxu0 %v4160_v58  ;;  %v4245_v58 = vld [vmem:[#allocation2 + $0x580] ss:$16 sps:$4 sm:$0xff]  }
  0x6b   :  { %1557 = vmatpush2.bf16.msra.mxu1 %v4161_v59  ;;  %1517 = vmatprep.subr.bf16.mxu0 %v4162_v60  ;;  %v4248_v59 = vld [vmem:[#allocation2 + $0x88] ss:$16 sps:$4 sm:$0xff]   ;;  %v4253_v60 = vld [vmem:[#allocation2 + $0x564] ss:$16 sps:$4 sm:$0xff]  }
  0x6c   :  { %1558 = vmatprep.subr.bf16.mxu1 %v4164_v61  ;;  %v4256_v61 = vld [vmem:[#allocation2 + $0x6c] ss:$16 sps:$4 sm:$0xff]  }
  0x6e   :  { %1518 = vmatpush2.bf16.msra.mxu0 %v4166_v62  ;;  %v4251_v62 = vld [vmem:[#allocation2 + $0x560] ss:$16 sps:$4 sm:$0xff]  }
  0x6f   :  { %1559 = vmatpush2.bf16.msra.mxu1 %v4167_v63  ;;  %1519 = vmatprep.subr.bf16.mxu0 %v4168_v0  ;;  %v4259_v63 = vld [vmem:[#allocation2 + $0x544] ss:$16 sps:$4 sm:$0xff]   ;;  %v4262_v0 = vld [vmem:[#allocation2 + $0x4c] ss:$16 sps:$4 sm:$0xff]  }
  0x70   :  { %1560 = vmatprep.subr.bf16.mxu1 %v4170_v1  ;;  %v4257_v1 = vld [vmem:[#allocation2 + $0x540] ss:$16 sps:$4 sm:$0xff]  }
  0x72   :  { %1520 = vmatpush2.bf16.msra.mxu0 %v4172_v2  ;;  %v4260_v2 = vld [vmem:[#allocation2 + $0x48] ss:$16 sps:$4 sm:$0xff]  }
  0x73   :  { %1561 = vmatpush2.bf16.msra.mxu1 %v4173_v3  ;;  %1571 = vmatprep.subr.bf16.mxu0 %v4180_v4  ;;  %v4265_v3 = vld [vmem:[#allocation2 + $0x524] ss:$16 sps:$4 sm:$0xff]   ;;  %v4268_v4 = vld [vmem:[#allocation2 + $0x2c] ss:$16 sps:$4 sm:$0xff]  }
  0x74   :  { %1612 = vmatprep.subr.bf16.mxu1 %v4183_v5  ;;  %v4263_v5 = vld [vmem:[#allocation2 + $0x520] ss:$16 sps:$4 sm:$0xff]  }
  0x75   :  { %1522 = vmatmul.mubr.bf16.vlgmr.msra.gmra.mxu0 %v4917_v6 }
  0x76   :  { %1563 = vmatmul.mubr.bf16.vlgmr.msra.gmra.mxu1 %v4919_v7  ;;  %1572 = vmatpush1.bf16.msra.mxu0 %v4178_v8  ;;  %v4266_v8 = vld [vmem:[#allocation2 + $0x28] ss:$16 sps:$4 sm:$0xff]  }
  0x77   :  { %1613 = vmatpush1.bf16.msra.mxu1 %v4181_v9  ;;  %1573 = vmatprep.subr.bf16.mxu0 %v4186_v10  ;;  %v4271_v9 = vld [vmem:[#allocation2 + $0x504] ss:$16 sps:$4 sm:$0xff]   ;;  %v4274_v10 = vld [vmem:[#allocation2 + $0xc] ss:$16 sps:$4 sm:$0xff]  }
  0x78   :  { %1614 = vmatprep.subr.bf16.mxu1 %v4189_v11  ;;  %1644 = vmatprep.mubr.bf16.mxu1 %v4830_v16  ;;  %v4269_v11 = vld [vmem:[#allocation2 + $0x500] ss:$16 sps:$4 sm:$0xff]  }
  0x79   :  { %1603 = vmatprep.mubr.bf16.mxu0 %v4931_v35 }
  0x7a   :  { %1574 = vmatpush1.bf16.msra.mxu0 %v4184_v12  ;;  %v4272_v12 = vld [vmem:[#allocation2 + $0x8] ss:$16 sps:$4 sm:$0xff]  }
  0x7b   :  { %1615 = vmatpush1.bf16.msra.mxu1 %v4187_v13  ;;  %1575 = vmatprep.subr.bf16.mxu0 %v4192_v14  ;;  %v4279_v13 = vld [vmem:[#allocation2 + $0x1ec] ss:$16 sps:$4 sm:$0xff]  }
  0x7c   :  { %1616 = vmatprep.subr.bf16.mxu1 %v4195_v15  ;;  %v4282_v14 = vld [vmem:[#allocation2 + $0x2ec] ss:$16 sps:$4 sm:$0xff]   ;;  %v4940_v15 = vcombine.low %v4927_v33, %v4927_v33  ;;  %v4301_v33 = vld [vmem:[#allocation2 + $0x168] ss:$16 sps:$4 sm:$0xff]  }
  0x7e   :  { %1576 = vmatpush1.bf16.msra.mxu0 %v4190_v17  ;;  %v4277_v17 = vld [vmem:[#allocation2 + $0x1e8] ss:$16 sps:$4 sm:$0xff]  }
  0x7f   :  { %1617 = vmatpush1.bf16.msra.mxu1 %v4193_v18  ;;  %1577 = vmatprep.subr.bf16.mxu0 %v4198_v19  ;;  %v4280_v18 = vld [vmem:[#allocation2 + $0x2e8] ss:$16 sps:$4 sm:$0xff]   ;;  %v4285_v19 = vld [vmem:[#allocation2 + $0x1cc] ss:$16 sps:$4 sm:$0xff]  }
  0x80   :  { %1618 = vmatprep.subr.bf16.mxu1 %v4201_v20  ;;  %v4288_v20 = vld [vmem:[#allocation2 + $0x2cc] ss:$16 sps:$4 sm:$0xff]  }
  0x82   :  { %1578 = vmatpush1.bf16.msra.mxu0 %v4196_v21  ;;  %v4283_v21 = vld [vmem:[#allocation2 + $0x1c8] ss:$16 sps:$4 sm:$0xff]  }
  0x83   :  { %1619 = vmatpush1.bf16.msra.mxu1 %v4199_v22  ;;  %1579 = vmatprep.subr.bf16.mxu0 %v4204_v23  ;;  %v4286_v22 = vld [vmem:[#allocation2 + $0x2c8] ss:$16 sps:$4 sm:$0xff]   ;;  %v4291_v23 = vld [vmem:[#allocation2 + $0x1ac] ss:$16 sps:$4 sm:$0xff]  }
  0x84   :  { %1620 = vmatprep.subr.bf16.mxu1 %v4207_v24  ;;  %v4294_v24 = vld [vmem:[#allocation2 + $0x2ac] ss:$16 sps:$4 sm:$0xff]  }
  0x86   :  { %1580 = vmatpush1.bf16.msra.mxu0 %v4202_v25  ;;  %v4289_v25 = vld [vmem:[#allocation2 + $0x1a8] ss:$16 sps:$4 sm:$0xff]  }
  0x87   :  { %1621 = vmatpush1.bf16.msra.mxu1 %v4205_v26  ;;  %1581 = vmatprep.subr.bf16.mxu0 %v4210_v27  ;;  %v4292_v26 = vld [vmem:[#allocation2 + $0x2a8] ss:$16 sps:$4 sm:$0xff]   ;;  %v4297_v27 = vld [vmem:[#allocation2 + $0x18c] ss:$16 sps:$4 sm:$0xff]  }
  0x88   :  { %1622 = vmatprep.subr.bf16.mxu1 %v4213_v28  ;;  %v4300_v28 = vld [vmem:[#allocation2 + $0x28c] ss:$16 sps:$4 sm:$0xff]  }
  0x8a   :  { %1582 = vmatpush1.bf16.msra.mxu0 %v4208_v29  ;;  %v4295_v29 = vld [vmem:[#allocation2 + $0x188] ss:$16 sps:$4 sm:$0xff]  }
  0x8b   :  { %1623 = vmatpush1.bf16.msra.mxu1 %v4211_v30  ;;  %1583 = vmatprep.subr.bf16.mxu0 %v4216_v31  ;;  %v4298_v30 = vld [vmem:[#allocation2 + $0x288] ss:$16 sps:$4 sm:$0xff]   ;;  %v4303_v31 = vld [vmem:[#allocation2 + $0x16c] ss:$16 sps:$4 sm:$0xff]  }
  0x8c   :  { %1624 = vmatprep.subr.bf16.mxu1 %v4219_v32  ;;  %v4306_v32 = vld [vmem:[#allocation2 + $0x26c] ss:$16 sps:$4 sm:$0xff]  }
  0x8e   :  { %1584 = vmatpush1.bf16.msra.mxu0 %v4214_v34  ;;  %v4309_v34 = vld [vmem:[#allocation2 + $0x14c] ss:$16 sps:$4 sm:$0xff]  }
  0x8f   :  { %1625 = vmatpush1.bf16.msra.mxu1 %v4217_v36  ;;  %1585 = vmatprep.subr.bf16.mxu0 %v4222_v37  ;;  %v4312_v36 = vld [vmem:[#allocation2 + $0x24c] ss:$16 sps:$4 sm:$0xff]   ;;  %v4307_v37 = vld [vmem:[#allocation2 + $0x148] ss:$16 sps:$4 sm:$0xff]  }
  0x90   :  { %1626 = vmatprep.subr.bf16.mxu1 %v4225_v38  ;;  %v4310_v38 = vld [vmem:[#allocation2 + $0x248] ss:$16 sps:$4 sm:$0xff]  }
  0x92   :  { %1586 = vmatpush1.bf16.msra.mxu0 %v4220_v39  ;;  %v4315_v39 = vld [vmem:[#allocation2 + $0x12c] ss:$16 sps:$4 sm:$0xff]  }
  0x93   :  { %1627 = vmatpush1.bf16.msra.mxu1 %v4223_v40  ;;  %1587 = vmatprep.subr.bf16.mxu0 %v4228_v41  ;;  %v4318_v40 = vld [vmem:[#allocation2 + $0x22c] ss:$16 sps:$4 sm:$0xff]   ;;  %v4313_v41 = vld [vmem:[#allocation2 + $0x128] ss:$16 sps:$4 sm:$0xff]  }
  0x94   :  { %1653 = vmatprep.subr.bf16.mxu1 %v4232_v42  ;;  %v4316_v42 = vld [vmem:[#allocation2 + $0x228] ss:$16 sps:$4 sm:$0xff]  }
  0x96   :  { %1645 = vmatmul.mubr.bf16.vlgmr.msra.gmra.mxu1 %v4229_v44  ;;  %1588 = vmatpush2.bf16.msra.mxu0 %v4226_v43  ;;  %v4321_v43 = vld [vmem:[#allocation2 + $0x10c] ss:$16 sps:$4 sm:$0xff]  }
  0x97   :  { %1654 = vmatpush1.bf16.msra.mxu1 %v4230_v45  ;;  %1589 = vmatprep.subr.bf16.mxu0 %v4235_v46  ;;  %v4324_v44 = vld [vmem:[#allocation2 + $0x20c] ss:$16 sps:$4 sm:$0xff]   ;;  %v4319_v45 = vld [vmem:[#allocation2 + $0x108] ss:$16 sps:$4 sm:$0xff]  }
  0x98   :  { %1655 = vmatprep.subr.bf16.mxu1 %v4238_v48  ;;  %1685 = vmatprep.mubr.bf16.mxu1 %v4908_v47  ;;  %v4254_v47 = vld [vmem:[#allocation2 + $0x68] ss:$16 sps:$4 sm:$0xff]   ;;  %v4327_v48 = vld [vmem:[#allocation2 + $0x3ec] ss:$16 sps:$4 sm:$0xff]  }
  0x99   :  { %v4322_v46 = vld [vmem:[#allocation2 + $0x208] ss:$16 sps:$4 sm:$0xff]  }
  0x9a   :  { %1590 = vmatpush2.bf16.msra.mxu0 %v4233_v49  ;;  %v4330_v49 = vld [vmem:[#allocation2 + $0x4ec] ss:$16 sps:$4 sm:$0xff]  }
  0x9b   :  { %1656 = vmatpush1.bf16.msra.mxu1 %v4236_v50  ;;  %1591 = vmatprep.subr.bf16.mxu0 %v4241_v52  ;;  %v4325_v50 = vld [vmem:[#allocation2 + $0x3e8] ss:$16 sps:$4 sm:$0xff]  }
  0x9c   :  { %1657 = vmatprep.subr.bf16.mxu1 %v4244_v53  ;;  %v4328_v52 = vld [vmem:[#allocation2 + $0x4e8] ss:$16 sps:$4 sm:$0xff]   ;;  %v4333_v53 = vld [vmem:[#allocation2 + $0x3cc] ss:$16 sps:$4 sm:$0xff]  }
  0x9e   :  { %1592 = vmatpush2.bf16.msra.mxu0 %v4239_v54  ;;  %v4336_v54 = vld [vmem:[#allocation2 + $0x4cc] ss:$16 sps:$4 sm:$0xff]  }
  0x9f   :  { %1658 = vmatpush1.bf16.msra.mxu1 %v4242_v55  ;;  %1593 = vmatprep.subr.bf16.mxu0 %v4247_v56  ;;  %v4331_v55 = vld [vmem:[#allocation2 + $0x3c8] ss:$16 sps:$4 sm:$0xff]  }
  0xa0   :  { %1659 = vmatprep.subr.bf16.mxu1 %v4250_v57  ;;  %v4334_v56 = vld [vmem:[#allocation2 + $0x4c8] ss:$16 sps:$4 sm:$0xff]   ;;  %v4339_v57 = vld [vmem:[#allocation2 + $0x3ac] ss:$16 sps:$4 sm:$0xff]  }
  0xa2   :  { %1594 = vmatpush2.bf16.msra.mxu0 %v4245_v58  ;;  %v4342_v58 = vld [vmem:[#allocation2 + $0x4ac] ss:$16 sps:$4 sm:$0xff]  }
  0xa3   :  { %1660 = vmatpush1.bf16.msra.mxu1 %v4248_v59  ;;  %1595 = vmatprep.subr.bf16.mxu0 %v4253_v60  ;;  %v4337_v59 = vld [vmem:[#allocation2 + $0x3a8] ss:$16 sps:$4 sm:$0xff]  }
  0xa4   :  { %1661 = vmatprep.subr.bf16.mxu1 %v4256_v61  ;;  %v4340_v60 = vld [vmem:[#allocation2 + $0x4a8] ss:$16 sps:$4 sm:$0xff]   ;;  %v4345_v61 = vld [vmem:[#allocation2 + $0x38c] ss:$16 sps:$4 sm:$0xff]  }
  0xa6   :  { %1596 = vmatpush2.bf16.msra.mxu0 %v4251_v62  ;;  %v4348_v62 = vld [vmem:[#allocation2 + $0x48c] ss:$16 sps:$4 sm:$0xff]  }
  0xa7   :  { %1662 = vmatpush1.bf16.msra.mxu1 %v4254_v47  ;;  %1597 = vmatprep.subr.bf16.mxu0 %v4259_v63  ;;  %v4343_v47 = vld [vmem:[#allocation2 + $0x388] ss:$16 sps:$4 sm:$0xff]   ;;  %v4351_v63 = vld [vmem:[#allocation2 + $0x36c] ss:$16 sps:$4 sm:$0xff]  }
  0xa8   :  { %1663 = vmatprep.subr.bf16.mxu1 %v4262_v0  ;;  %v4354_v0 = vld [vmem:[#allocation2 + $0x46c] ss:$16 sps:$4 sm:$0xff]  }
  0xaa   :  { %1598 = vmatpush2.bf16.msra.mxu0 %v4257_v1  ;;  %v4349_v1 = vld [vmem:[#allocation2 + $0x368] ss:$16 sps:$4 sm:$0xff]  }
  0xab   :  { %1664 = vmatpush1.bf16.msra.mxu1 %v4260_v2  ;;  %1599 = vmatprep.subr.bf16.mxu0 %v4265_v3  ;;  %v4352_v2 = vld [vmem:[#allocation2 + $0x468] ss:$16 sps:$4 sm:$0xff]   ;;  %v4357_v3 = vld [vmem:[#allocation2 + $0x34c] ss:$16 sps:$4 sm:$0xff]  }
  0xac   :  { %1665 = vmatprep.subr.bf16.mxu1 %v4268_v4  ;;  %v4360_v4 = vld [vmem:[#allocation2 + $0x44c] ss:$16 sps:$4 sm:$0xff]  }
  0xae   :  { %1600 = vmatpush2.bf16.msra.mxu0 %v4263_v5  ;;  %v4358_v5 = vld [vmem:[#allocation2 + $0x448] ss:$16 sps:$4 sm:$0xff]  }
  0xaf   :  { %1666 = vmatpush1.bf16.msra.mxu1 %v4266_v8  ;;  %1601 = vmatprep.subr.bf16.mxu0 %v4271_v9  ;;  %v4363_v8 = vld [vmem:[#allocation2 + $0x32c] ss:$16 sps:$4 sm:$0xff]  }
  0xb0   :  { %1667 = vmatprep.subr.bf16.mxu1 %v4274_v10  ;;  %v4366_v9 = vld [vmem:[#allocation2 + $0x42c] ss:$16 sps:$4 sm:$0xff]   ;;  %v4361_v10 = vld [vmem:[#allocation2 + $0x328] ss:$16 sps:$4 sm:$0xff]  }
  0xb2   :  { %1602 = vmatpush2.bf16.msra.mxu0 %v4269_v11  ;;  %v4364_v11 = vld [vmem:[#allocation2 + $0x428] ss:$16 sps:$4 sm:$0xff]  }
  0xb3   :  { %1668 = vmatpush1.bf16.msra.mxu1 %v4272_v12  ;;  %1694 = vmatprep.subr.bf16.mxu0 %v4282_v14  ;;  %v4369_v12 = vld [vmem:[#allocation2 + $0x30c] ss:$16 sps:$4 sm:$0xff]   ;;  %v4367_v14 = vld [vmem:[#allocation2 + $0x308] ss:$16 sps:$4 sm:$0xff]  }
  0xb4   :  { %1669 = vmatprep.subr.bf16.mxu1 %v4279_v13  ;;  %v4372_v13 = vld [vmem:[#allocation2 + $0x40c] ss:$16 sps:$4 sm:$0xff]  }
  0xb5   :  { %1604 = vmatmul.mubr.bf16.vlgmr.msra.gmra.mxu0 %v4940_v15 }
  0xb6   :  { %1695 = vmatpush1.bf16.msra.mxu0 %v4280_v18  ;;  %1726 = vmatprep.mubr.bf16.mxu0 %v4913_v51  ;;  %v4304_v51 = vld [vmem:[#allocation2 + $0x268] ss:$16 sps:$4 sm:$0xff]   ;;  %v4375_v18 = vld [vmem:[#allocation2 + $0x5ec] ss:$16 sps:$4 sm:$0xff]  }
  0xb7   :  { %1670 = vmatpush2.bf16.msra.mxu1 %v4277_v17  ;;  %1696 = vmatprep.subr.bf16.mxu0 %v4288_v20  ;;  %v4370_v17 = vld [vmem:[#allocation2 + $0x408] ss:$16 sps:$4 sm:$0xff]  }
  0xb8   :  { %1671 = vmatprep.subr.bf16.mxu1 %v4285_v19  ;;  %v4378_v19 = vld [vmem:[#allocation2 + $0x6ec] ss:$16 sps:$4 sm:$0xff]   ;;  %v4373_v20 = vld [vmem:[#allocation2 + $0x5e8] ss:$16 sps:$4 sm:$0xff]  }
  0xba   :  { %1697 = vmatpush1.bf16.msra.mxu0 %v4286_v22  ;;  %v4381_v22 = vld [vmem:[#allocation2 + $0x5cc] ss:$16 sps:$4 sm:$0xff]  }
  0xbb   :  { %1672 = vmatpush2.bf16.msra.mxu1 %v4283_v21  ;;  %1698 = vmatprep.subr.bf16.mxu0 %v4294_v24  ;;  %v4376_v21 = vld [vmem:[#allocation2 + $0x6e8] ss:$16 sps:$4 sm:$0xff]  }
  0xbc   :  { %1673 = vmatprep.subr.bf16.mxu1 %v4291_v23  ;;  %v4384_v23 = vld [vmem:[#allocation2 + $0x6cc] ss:$16 sps:$4 sm:$0xff]   ;;  %v4379_v24 = vld [vmem:[#allocation2 + $0x5c8] ss:$16 sps:$4 sm:$0xff]  }
  0xbe   :  { %1699 = vmatpush1.bf16.msra.mxu0 %v4292_v26  ;;  %v4387_v26 = vld [vmem:[#allocation2 + $0x5ac] ss:$16 sps:$4 sm:$0xff]  }
  0xbf   :  { %1674 = vmatpush2.bf16.msra.mxu1 %v4289_v25  ;;  %1700 = vmatprep.subr.bf16.mxu0 %v4300_v28  ;;  %v4382_v25 = vld [vmem:[#allocation2 + $0x6c8] ss:$16 sps:$4 sm:$0xff]  }
  0xc0   :  { %1675 = vmatprep.subr.bf16.mxu1 %v4297_v27  ;;  %v4390_v27 = vld [vmem:[#allocation2 + $0x6ac] ss:$16 sps:$4 sm:$0xff]   ;;  %v4385_v28 = vld [vmem:[#allocation2 + $0x5a8] ss:$16 sps:$4 sm:$0xff]  }
  0xc2   :  { %1701 = vmatpush1.bf16.msra.mxu0 %v4298_v30  ;;  %v4393_v30 = vld [vmem:[#allocation2 + $0x58c] ss:$16 sps:$4 sm:$0xff]  }
  0xc3   :  { %1676 = vmatpush2.bf16.msra.mxu1 %v4295_v29  ;;  %1702 = vmatprep.subr.bf16.mxu0 %v4306_v32  ;;  %v4388_v29 = vld [vmem:[#allocation2 + $0x6a8] ss:$16 sps:$4 sm:$0xff]  }
  0xc4   :  { %1677 = vmatprep.subr.bf16.mxu1 %v4303_v31  ;;  %v4396_v31 = vld [vmem:[#allocation2 + $0x68c] ss:$16 sps:$4 sm:$0xff]   ;;  %v4391_v32 = vld [vmem:[#allocation2 + $0x588] ss:$16 sps:$4 sm:$0xff]  }
  0xc6   :  { %1703 = vmatpush1.bf16.msra.mxu0 %v4304_v51  ;;  %v4402_v51 = vld [vmem:[#allocation2 + $0x66c] ss:$16 sps:$4 sm:$0xff]  }
  0xc7   :  { %1678 = vmatpush2.bf16.msra.mxu1 %v4301_v33  ;;  %1704 = vmatprep.subr.bf16.mxu0 %v4312_v36  ;;  %v4394_v33 = vld [vmem:[#allocation2 + $0x688] ss:$16 sps:$4 sm:$0xff]  }
  0xc8   :  { %1679 = vmatprep.subr.bf16.mxu1 %v4309_v34  ;;  %v4397_v34 = vld [vmem:[#allocation2 + $0x568] ss:$16 sps:$4 sm:$0xff]  }
  0xc9   :  { %v4400_v36 = vld [vmem:[#allocation2 + $0x668] ss:$16 sps:$4 sm:$0xff]  }
  0xca   :  { %1705 = vmatpush1.bf16.msra.mxu0 %v4310_v38  ;;  %v4403_v38 = vld [vmem:[#allocation2 + $0x548] ss:$16 sps:$4 sm:$0xff]  }
  0xcb   :  { %1680 = vmatpush2.bf16.msra.mxu1 %v4307_v37  ;;  %1706 = vmatprep.subr.bf16.mxu0 %v4318_v40  ;;  %v4405_v37 = vld [vmem:[#allocation2 + $0x54c] ss:$16 sps:$4 sm:$0xff]  }
  0xcc   :  { %1681 = vmatprep.subr.bf16.mxu1 %v4315_v39  ;;  %v4406_v39 = vld [vmem:[#allocation2 + $0x648] ss:$16 sps:$4 sm:$0xff]   ;;  %v4411_v40 = vld [vmem:[#allocation2 + $0x52c] ss:$16 sps:$4 sm:$0xff]  }
  0xce   :  { %1707 = vmatpush1.bf16.msra.mxu0 %v4316_v42  ;;  %v4409_v42 = vld [vmem:[#allocation2 + $0x528] ss:$16 sps:$4 sm:$0xff]  }
  0xcf   :  { %1682 = vmatpush2.bf16.msra.mxu1 %v4313_v41  ;;  %1708 = vmatprep.subr.bf16.mxu0 %v4324_v44  ;;  %v4414_v41 = vld [vmem:[#allocation2 + $0x62c] ss:$16 sps:$4 sm:$0xff]  }
  0xd0   :  { %1683 = vmatprep.subr.bf16.mxu1 %v4321_v43  ;;  %v4412_v43 = vld [vmem:[#allocation2 + $0x628] ss:$16 sps:$4 sm:$0xff]   ;;  %v4417_v44 = vld [vmem:[#allocation2 + $0x50c] ss:$16 sps:$4 sm:$0xff]  }
  0xd2   :  { %1709 = vmatpush1.bf16.msra.mxu0 %v4322_v46  ;;  %v4415_v46 = vld [vmem:[#allocation2 + $0x508] ss:$16 sps:$4 sm:$0xff]  }
  0xd3   :  { %1684 = vmatpush2.bf16.msra.mxu1 %v4319_v45  ;;  %1710 = vmatprep.subr.bf16.mxu0 %v4327_v48  ;;  %v4420_v45 = vld [vmem:[#allocation2 + $0x60c] ss:$16 sps:$4 sm:$0xff]   ;;  %v4418_v48 = vld [vmem:[#allocation2 + $0x608] ss:$16 sps:$4 sm:$0xff]  }
  0xd4   :  { %1735 = vmatprep.subr.bf16.mxu1 %v4330_v49  ;;  %v4423_v49 = vld [vmem:[#allocation4 + $0xe4] ss:$16 sps:$4 sm:$0xff]  }
  0xd6   :  { %1686 = vmatmul.mubr.bf16.vlgmr.msra.gmra.mxu1 %v4917_v6  ;;  %1711 = vmatpush2.bf16.msra.mxu0 %v4325_v50  ;;  %v4346_v6 = vld [vmem:[#allocation2 + $0x488] ss:$16 sps:$4 sm:$0xff]   ;;  %v4421_v50 = vld [vmem:[#allocation4 + $0xe0] ss:$16 sps:$4 sm:$0xff]  }
  0xd7   :  { %1736 = vmatpush1.bf16.msra.mxu1 %v4328_v52  ;;  %1712 = vmatprep.subr.bf16.mxu0 %v4333_v53  ;;  %v4426_v52 = vld [vmem:[#allocation4 + $0xc4] ss:$16 sps:$4 sm:$0xff]   ;;  %v4424_v53 = vld [vmem:[#allocation4 + $0xc0] ss:$16 sps:$4 sm:$0xff]  }
  0xd8   :  { %1737 = vmatprep.subr.bf16.mxu1 %v4336_v54  ;;  %1767 = vmatprep.mubr.bf16.mxu1 %v4931_v35  ;;  %v4355_v35 = vld [vmem:[#allocation2 + $0x348] ss:$16 sps:$4 sm:$0xff]  }
  0xd9   :  { %v4733_v54 = vld [vmem:[%s5074_s0 + $0x18] ss:$0 sps:$4 sm:$0xff]  }
  0xda   :  { %1713 = vmatpush2.bf16.msra.mxu0 %v4331_v55  ;;  %v4429_v55 = vld [vmem:[#allocation4 + $0xa4] ss:$16 sps:$4 sm:$0xff]  }
  0xdb   :  { %1738 = vmatpush1.bf16.msra.mxu1 %v4334_v56  ;;  %1714 = vmatprep.subr.bf16.mxu0 %v4339_v57  ;;  %v4427_v56 = vld [vmem:[#allocation4 + $0xa0] ss:$16 sps:$4 sm:$0xff]   ;;  %v4432_v57 = vld [vmem:[#allocation4 + $0x84] ss:$16 sps:$4 sm:$0xff]  }
  0xdc   :  { %1739 = vmatprep.subr.bf16.mxu1 %v4342_v58  ;;  %v4430_v58 = vld [vmem:[#allocation4 + $0x80] ss:$16 sps:$4 sm:$0xff]  }
  0xde   :  { %1715 = vmatpush2.bf16.msra.mxu0 %v4337_v59  ;;  %v4493_v59 = vld [vmem:[#allocation4 + $0x2e0] ss:$16 sps:$4 sm:$0xff]  }
  0xdf   :  { %1740 = vmatpush1.bf16.msra.mxu1 %v4340_v60  ;;  %1716 = vmatprep.subr.bf16.mxu0 %v4345_v61  ;;  %v4495_v60 = vld [vmem:[#allocation4 + $0x2e4] ss:$16 sps:$4 sm:$0xff]  }
  0xe0   :  { %1741 = vmatprep.subr.bf16.mxu1 %v4348_v62  ;;  %v4435_v61 = vld [vmem:[#allocation4 + $0x64] ss:$16 sps:$4 sm:$0xff]   ;;  %v4499_v62 = vld [vmem:[#allocation4 + $0x2c0] ss:$16 sps:$4 sm:$0xff]  }
  0xe2   :  { %1717 = vmatpush2.bf16.msra.mxu0 %v4343_v47  ;;  %v4501_v47 = vld [vmem:[#allocation4 + $0x2c4] ss:$16 sps:$4 sm:$0xff]  }
  0xe3   :  { %1742 = vmatpush1.bf16.msra.mxu1 %v4346_v6  ;;  %1718 = vmatprep.subr.bf16.mxu0 %v4351_v63  ;;  %v4438_v6 = vld [vmem:[#allocation4 + $0x44] ss:$16 sps:$4 sm:$0xff]   ;;  %v4436_v63 = vld [vmem:[#allocation4 + $0x40] ss:$16 sps:$4 sm:$0xff]  }
  0xe4   :  { %1743 = vmatprep.subr.bf16.mxu1 %v4354_v0  ;;  %v4505_v0 = vld [vmem:[#allocation4 + $0x2a0] ss:$16 sps:$4 sm:$0xff]  }
  0xe6   :  { %1719 = vmatpush2.bf16.msra.mxu0 %v4349_v1  ;;  %v4507_v1 = vld [vmem:[#allocation4 + $0x2a4] ss:$16 sps:$4 sm:$0xff]  }
  0xe7   :  { %1744 = vmatpush1.bf16.msra.mxu1 %v4352_v2  ;;  %1720 = vmatprep.subr.bf16.mxu0 %v4357_v3  ;;  %v4441_v2 = vld [vmem:[#allocation4 + $0x24] ss:$16 sps:$4 sm:$0xff]   ;;  %v4439_v3 = vld [vmem:[#allocation4 + $0x20] ss:$16 sps:$4 sm:$0xff]  }
  0xe8   :  { %1745 = vmatprep.subr.bf16.mxu1 %v4360_v4  ;;  %v4511_v4 = vld [vmem:[#allocation4 + $0x280] ss:$16 sps:$4 sm:$0xff]  }
  0xea   :  { %1721 = vmatpush2.bf16.msra.mxu0 %v4355_v35  ;;  %v4513_v35 = vld [vmem:[#allocation4 + $0x284] ss:$16 sps:$4 sm:$0xff]  }
  0xeb   :  { %1746 = vmatpush1.bf16.msra.mxu1 %v4358_v5  ;;  %1722 = vmatprep.subr.bf16.mxu0 %v4363_v8  ;;  %v4444_v5 = vld [vmem:[#allocation4 + $0x4] ss:$16 sps:$4 sm:$0xff]   ;;  %v4442_v8 = vld [vmem:[#allocation4] ss:$16 sps:$4 sm:$0xff]  }
  0xec   :  { %1747 = vmatprep.subr.bf16.mxu1 %v4366_v9  ;;  %v4517_v9 = vld [vmem:[#allocation4 + $0x260] ss:$16 sps:$4 sm:$0xff]  }
  0xee   :  { %1723 = vmatpush2.bf16.msra.mxu0 %v4361_v10  ;;  %v4519_v10 = vld [vmem:[#allocation4 + $0x264] ss:$16 sps:$4 sm:$0xff]  }
  0xef   :  { %1748 = vmatpush1.bf16.msra.mxu1 %v4364_v11  ;;  %1724 = vmatprep.subr.bf16.mxu0 %v4369_v12  ;;  %v4447_v11 = vld [vmem:[#allocation4 + $0x1e4] ss:$16 sps:$4 sm:$0xff]   ;;  %v4445_v12 = vld [vmem:[#allocation4 + $0x1e0] ss:$16 sps:$4 sm:$0xff]  }
  0xf0   :  { %1749 = vmatprep.subr.bf16.mxu1 %v4372_v13  ;;  %v4523_v13 = vld [vmem:[#allocation4 + $0x240] ss:$16 sps:$4 sm:$0xff]  }
  0xf2   :  { %1725 = vmatpush2.bf16.msra.mxu0 %v4367_v14  ;;  %v4525_v14 = vld [vmem:[#allocation4 + $0x244] ss:$16 sps:$4 sm:$0xff]  }
  0xf3   :  { %1750 = vmatpush1.bf16.msra.mxu1 %v4370_v17  ;;  %1776 = vmatprep.subr.bf16.mxu0 %v4378_v19  ;;  %v4450_v17 = vld [vmem:[#allocation4 + $0x1c4] ss:$16 sps:$4 sm:$0xff]  }
  0xf4   :  { %1751 = vmatprep.subr.bf16.mxu1 %v4375_v18 }
  0xf5   :  { %1727 = vmatmul.mubr.bf16.vlgmr.msra.gmra.mxu0 %v4919_v7  ;;  %v4399_v7 = vld [vmem:[#allocation2 + $0x56c] ss:$16 sps:$4 sm:$0xff]  }
  0xf6   :  { %1777 = vmatpush1.bf16.msra.mxu0 %v4376_v21  ;;  %1808 = vmatprep.mubr.bf16.mxu0 %v4830_v16  ;;  %v4408_v16 = vld [vmem:[#allocation2 + $0x64c] ss:$16 sps:$4 sm:$0xff]  }
  0xf7   :  { %1752 = vmatpush2.bf16.msra.mxu1 %v4373_v20  ;;  %1778 = vmatprep.subr.bf16.mxu0 %v4384_v23  ;;  %v4448_v20 = vld [vmem:[#allocation4 + $0x1c0] ss:$16 sps:$4 sm:$0xff]   ;;  %v4453_v23 = vld [vmem:[#allocation4 + $0x1a4] ss:$16 sps:$4 sm:$0xff]  }
  0xf8   :  { %1753 = vmatprep.subr.bf16.mxu1 %v4381_v22 }
  0xfa   :  { %1779 = vmatpush1.bf16.msra.mxu0 %v4382_v25  ;;  %v4529_v25 = vld [vmem:[#allocation4 + $0x220] ss:$16 sps:$4 sm:$0xff]  }
  0xfb   :  { %1754 = vmatpush2.bf16.msra.mxu1 %v4379_v24  ;;  %1780 = vmatprep.subr.bf16.mxu0 %v4390_v27  ;;  %v4531_v24 = vld [vmem:[#allocation4 + $0x224] ss:$16 sps:$4 sm:$0xff]  }
  0xfc   :  { %1755 = vmatprep.subr.bf16.mxu1 %v4387_v26 }
  0xfe   :  { %1781 = vmatpush1.bf16.msra.mxu0 %v4388_v29 }
  0xff   :  { %1756 = vmatpush2.bf16.msra.mxu1 %v4385_v28  ;;  %1782 = vmatprep.subr.bf16.mxu0 %v4396_v31  ;;  %v4451_v28 = vld [vmem:[#allocation4 + $0x1a0] ss:$16 sps:$4 sm:$0xff]   ;;  %v4456_v31 = vld [vmem:[#allocation4 + $0x184] ss:$16 sps:$4 sm:$0xff]  }
 0x100   :  { %1757 = vmatprep.subr.bf16.mxu1 %v4393_v30 }
 0x102   :  { %1783 = vmatpush1.bf16.msra.mxu0 %v4394_v33  ;;  %v4537_v33 = vld [vmem:[#allocation4 + $0x204] ss:$16 sps:$4 sm:$0xff]  }
 0x103   :  { %1758 = vmatpush2.bf16.msra.mxu1 %v4391_v32  ;;  %1784 = vmatprep.subr.bf16.mxu0 %v4402_v51  ;;  %v4535_v32 = vld [vmem:[#allocation4 + $0x200] ss:$16 sps:$4 sm:$0xff]  }
 0x104   :  { %1759 = vmatprep.subr.bf16.mxu1 %v4399_v7  ;;  %v4454_v7 = vld [vmem:[#allocation4 + $0x180] ss:$16 sps:$4 sm:$0xff]  }
 0x105   :  { %v4541_v51 = vld [vmem:[#allocation4 + $0x3e0] ss:$16 sps:$4 sm:$0xff]  }
 0x106   :  { %1785 = vmatpush1.bf16.msra.mxu0 %v4400_v36  ;;  %v4459_v36 = vld [vmem:[#allocation4 + $0x164] ss:$16 sps:$4 sm:$0xff]  }
 0x107   :  { %1760 = vmatpush2.bf16.msra.mxu1 %v4397_v34  ;;  %1786 = vmatprep.subr.bf16.mxu0 %v4408_v16  ;;  %v4543_v34 = vld [vmem:[#allocation4 + $0x3e4] ss:$16 sps:$4 sm:$0xff]   ;;  %v4457_v16 = vld [vmem:[#allocation4 + $0x160] ss:$16 sps:$4 sm:$0xff]  }
 0x108   :  { %1761 = vmatprep.subr.bf16.mxu1 %v4405_v37  ;;  %v4546_v37 = vld [vmem:[#allocation4 + $0x3c4] ss:$16 sps:$4 sm:$0xff]  }
 0x10a   :  { %1787 = vmatpush1.bf16.msra.mxu0 %v4406_v39  ;;  %v4462_v39 = vld [vmem:[#allocation4 + $0x144] ss:$16 sps:$4 sm:$0xff]  }
 0x10b   :  { %1762 = vmatpush2.bf16.msra.mxu1 %v4403_v38  ;;  %1788 = vmatprep.subr.bf16.mxu0 %v4414_v41  ;;  %v4544_v38 = vld [vmem:[#allocation4 + $0x3c0] ss:$16 sps:$4 sm:$0xff]  }
 0x10c   :  { %1763 = vmatprep.subr.bf16.mxu1 %v4411_v40  ;;  %v4549_v40 = vld [vmem:[#allocation4 + $0x3a4] ss:$16 sps:$4 sm:$0xff]   ;;  %v4460_v41 = vld [vmem:[#allocation4 + $0x140] ss:$16 sps:$4 sm:$0xff]  }
 0x10e   :  { %1789 = vmatpush1.bf16.msra.mxu0 %v4412_v43  ;;  %v4465_v43 = vld [vmem:[#allocation4 + $0x124] ss:$16 sps:$4 sm:$0xff]  }
 0x10f   :  { %1764 = vmatpush2.bf16.msra.mxu1 %v4409_v42  ;;  %1790 = vmatprep.subr.bf16.mxu0 %v4420_v45  ;;  %v4547_v42 = vld [vmem:[#allocation4 + $0x3a0] ss:$16 sps:$4 sm:$0xff]  }
 0x110   :  { %1765 = vmatprep.subr.bf16.mxu1 %v4417_v44  ;;  %v4552_v44 = vld [vmem:[#allocation4 + $0x384] ss:$16 sps:$4 sm:$0xff]   ;;  %v4463_v45 = vld [vmem:[#allocation4 + $0x120] ss:$16 sps:$4 sm:$0xff]  }
 0x112   :  { %1791 = vmatpush1.bf16.msra.mxu0 %v4418_v48  ;;  %v4468_v48 = vld [vmem:[#allocation4 + $0x104] ss:$16 sps:$4 sm:$0xff]  }
 0x113   :  { %1766 = vmatpush2.bf16.msra.mxu1 %v4415_v46  ;;  %2615 = vmatprep.subr.bf16.mxu0 %v4423_v49  ;;  %v4550_v46 = vld [vmem:[#allocation4 + $0x380] ss:$16 sps:$4 sm:$0xff]   ;;  %v4555_v49 = vld [vmem:[#allocation4 + $0x364] ss:$16 sps:$4 sm:$0xff]  }
 0x114   :  { %2656 = vmatprep.subr.bf16.mxu1 %v4495_v60 }
 0x115   :  { %1809 = vmatmul.mubr.bf16.vlgmr.msra.gmra.mxu0 %v4733_v54  ;;  %v4558_v54 = vld [vmem:[#allocation4 + $0x344] ss:$16 sps:$4 sm:$0xff]  }
 0x116   :  { %1768 = vmatmul.mubr.bf16.vlgmr.msra.gmra.mxu1 %v4940_v15  ;;  %2616 = vmatpush1.bf16.msra.mxu0 %v4421_v50  ;;  %v4433_v15 = vld [vmem:[#allocation4 + $0x60] ss:$16 sps:$4 sm:$0xff]  }
 0x117   :  { %2617 = vmatprep.subr.bf16.mxu0 %v4426_v52  ;;  %2657 = vmatpush1.bf16.msra.mxu1 %v4493_v59  ;;  %v4466_v50 = vld [vmem:[#allocation4 + $0x100] ss:$16 sps:$4 sm:$0xff]  }
 0x118   :  { %2658 = vmatprep.subr.bf16.mxu1 %v4501_v47  ;;  %v4553_v52 = vld [vmem:[#allocation4 + $0x360] ss:$16 sps:$4 sm:$0xff]   ;;  %v4567_v47 = vld [vmem:[#allocation4 + $0x2ec] ss:$16 sps:$4 sm:$0xff]  }
 0x119   :  { %v4559_v59 = vld [vmem:[#allocation4 + $0x320] ss:$16 sps:$4 sm:$0xff]  }
 0x11a   :  { %2618 = vmatpush1.bf16.msra.mxu0 %v4424_v53  ;;  %v4471_v53 = vld [vmem:[#allocation4 + $0xec] ss:$16 sps:$4 sm:$0xff]  }
 0x11b   :  { %2619 = vmatprep.subr.bf16.mxu0 %v4429_v55  ;;  %2659 = vmatpush1.bf16.msra.mxu1 %v4499_v62  ;;  %v4556_v55 = vld [vmem:[#allocation4 + $0x340] ss:$16 sps:$4 sm:$0xff]  }
 0x11c   :  { %2660 = vmatprep.subr.bf16.mxu1 %v4507_v1  ;;  %v4562_v62 = vld [vmem:[#allocation4 + $0x300] ss:$16 sps:$4 sm:$0xff]  }
 0x11d   :  { %v4968_v1 = vld [vmem:[%s5076_s2] sm:$0xf] }
 0x11e   :  { %2620 = vmatpush1.bf16.msra.mxu0 %v4427_v56 }
 0x11f   :  { %2621 = vmatprep.subr.bf16.mxu0 %v4432_v57  ;;  %2661 = vmatpush1.bf16.msra.mxu1 %v4505_v0 }
 0x120   :  { %2662 = vmatprep.subr.bf16.mxu1 %v4513_v35 }
 0x122   :  { %2622 = vmatpush1.bf16.msra.mxu0 %v4430_v58  ;;  %v4561_v58 = vld [vmem:[#allocation4 + $0x324] ss:$16 sps:$4 sm:$0xff]  }
 0x123   :  { %2623 = vmatprep.subr.bf16.mxu0 %v4435_v61  ;;  %2663 = vmatpush1.bf16.msra.mxu1 %v4511_v4 }
 0x124   :  { %2664 = vmatprep.subr.bf16.mxu1 %v4519_v10 }
 0x126   :  { %2624 = vmatpush1.bf16.msra.mxu0 %v4433_v15  ;;  %v4564_v15 = vld [vmem:[#allocation4 + $0x304] ss:$16 sps:$4 sm:$0xff]  }
 0x127   :  { %2625 = vmatprep.subr.bf16.mxu0 %v4438_v6  ;;  %2665 = vmatpush1.bf16.msra.mxu1 %v4517_v9  ;;  %v324_v6 = vlaneseq }
 0x128   :  { %2666 = vmatprep.subr.bf16.mxu1 %v4525_v14 }
 0x12a   :  { %2626 = vmatpush1.bf16.msra.mxu0 %v4436_v63  ;;  %v4960_v63 = vshrl.u32 %v324_v6, 7  ;;  %v4618_v6 = vld [vmem:[#allocation6 + $0x64] ss:$8 sps:$4 sm:$0xff]  }
 0x12b   :  { %2627 = vmatprep.subr.bf16.mxu0 %v4441_v2  ;;  %2667 = vmatpush1.bf16.msra.mxu1 %v4523_v13 }
 0x12c   :  { %2668 = vmatprep.subr.bf16.mxu1 %v4531_v24  ;;  %v4963_v0 = vsub.s32 0, %v4960_v63  ;;  %v4971_v2 = vsub.s32 1, %v4960_v63 }
 0x12e   :  { %2628 = vmatpush1.bf16.msra.mxu0 %v4439_v3  ;;  %v327_v3 = vrot.slane %v4968_v1, %v4963_v0  ;;  %v331_v4 = vrot.slane %v4968_v1, %v4971_v2 }
 0x12f   :  { %2629 = vmatprep.subr.bf16.mxu0 %v4444_v5  ;;  %2669 = vmatpush1.bf16.msra.mxu1 %v4529_v25 }
 0x130   :  { %2670 = vmatprep.subr.bf16.mxu1 %v4537_v33  ;;  %v4486_v33 = vld [vmem:[#allocation4 + $0x4c] ss:$16 sps:$4 sm:$0xff]  }
 0x132   :  { %2630 = vmatpush1.bf16.msra.mxu0 %v4442_v8 }
 0x133   :  { %2631 = vmatprep.subr.bf16.mxu0 %v4447_v11  ;;  %2671 = vmatpush1.bf16.msra.mxu1 %v4535_v32  ;;  %v4481_v32 = vld [vmem:[#allocation4 + $0x68] ss:$16 sps:$4 sm:$0xff]  }
 0x134   :  { %2672 = vmatprep.subr.bf16.mxu1 %v4543_v34 }
 0x135   :  { %v4952_v18 = vpop.f32.mrf.mxu0 }
 0x136   :  { %v4954_v19 = vpop.f32.mrf.mxu1  ;;  %2632 = vmatpush2.bf16.msra.mxu0 %v4445_v12  ;;  %v1524_v35 = vadd.f32 %v4952_v18, %v327_v3  ;;  %v4474_v18 = vld [vmem:[#allocation4 + $0xcc] ss:$16 sps:$4 sm:$0xff]   ;;  %v334_v3 = vsub.s32 2, %v4960_v63 }
 0x137   :  { %v4956_v21 = vpop.f32.mrf.mxu0  ;;  %2633 = vmatprep.subr.bf16.mxu0 %v4450_v17  ;;  %2673 = vmatpush2.bf16.msra.mxu1 %v4541_v51  ;;  %v4489_v51 = vld [vmem:[#allocation4 + $0x2c] ss:$16 sps:$4 sm:$0xff]  }
 0x138   :  { %v4958_v22 = vpop.f32.mrf.mxu1  ;;  %2674 = vmatprep.subr.bf16.mxu1 %v4546_v37  ;;  %v1526_v5 = vadd.f32 %v4956_v21, %v331_v4  ;;  %v1565_v8 = vadd.f32 %v4954_v19, %v1524_v35  ;;  %v4472_v19 = vld [vmem:[#allocation4 + $0xc8] ss:$16 sps:$4 sm:$0xff]   ;;  %v4477_v21 = vld [vmem:[#allocation4 + $0xac] ss:$16 sps:$4 sm:$0xff]  }
 0x139   :  { %v1527_v26 = vpop.f32.mrf.mxu0  ;;  %v4616_v4 = vld [vmem:[#allocation6 + $0x60] ss:$8 sps:$4 sm:$0xff]   ;;  %v4621_v35 = vld [vmem:[#allocation6 + $0x54] ss:$8 sps:$4 sm:$0xff]  }
 0x13a   :  { %v1568_v27 = vpop.f32.mrf.mxu1  ;;  %2634 = vmatpush2.bf16.msra.mxu0 %v4448_v20  ;;  %v1567_v10 = vadd.f32 %v4958_v22, %v1526_v5  ;;  %v4475_v22 = vld [vmem:[#allocation4 + $0xa8] ss:$16 sps:$4 sm:$0xff]   ;;  %v338_v5 = vsub.s32 3, %v4960_v63 }
 0x13b   :  { %v1528_v29 = vpop.f32.mrf.mxu0  ;;  %2635 = vmatprep.subr.bf16.mxu0 %v4453_v23  ;;  %2675 = vmatpush2.bf16.msra.mxu1 %v4544_v38  ;;  %v4469_v27 = vld [vmem:[#allocation4 + $0xe8] ss:$16 sps:$4 sm:$0xff]  }
 0x13c   :  { %v1569_v30 = vpop.f32.mrf.mxu1  ;;  %2676 = vmatprep.subr.bf16.mxu1 %v4549_v40  ;;  %v4480_v29 = vld [vmem:[#allocation4 + $0x8c] ss:$16 sps:$4 sm:$0xff]  }
 0x13d   :  { %v4478_v30 = vld [vmem:[#allocation4 + $0x88] ss:$16 sps:$4 sm:$0xff]  }
 0x13e   :  { %2636 = vmatpush2.bf16.msra.mxu0 %v4451_v28  ;;  %v4710_v63 = vld [vmem:[%s5081_s7 + $0x38] sm:$0xff]  }
 0x13f   :  { %2637 = vmatprep.subr.bf16.mxu0 %v4456_v31  ;;  %2677 = vmatpush2.bf16.msra.mxu1 %v4547_v42  ;;  %v4483_v31 = vld [vmem:[#allocation4 + $0x6c] ss:$16 sps:$4 sm:$0xff]   ;;  %v4496_v42 = vld [vmem:[#allocation4 + $0x1e8] ss:$16 sps:$4 sm:$0xff]  }
 0x140   :  { %2678 = vmatprep.subr.bf16.mxu1 %v4552_v44  ;;  %v4502_v44 = vld [vmem:[#allocation4 + $0x1c8] ss:$16 sps:$4 sm:$0xff]  }
 0x142   :  { %2638 = vmatpush2.bf16.msra.mxu0 %v4454_v7  ;;  %v4484_v7 = vld [vmem:[#allocation4 + $0x48] ss:$16 sps:$4 sm:$0xff]  }
 0x143   :  { %2639 = vmatprep.subr.bf16.mxu0 %v4459_v36  ;;  %2679 = vmatpush2.bf16.msra.mxu1 %v4550_v46  ;;  %v4487_v36 = vld [vmem:[#allocation4 + $0x28] ss:$16 sps:$4 sm:$0xff]  }
 0x144   :  { %2680 = vmatprep.subr.bf16.mxu1 %v4555_v49  ;;  %v4508_v46 = vld [vmem:[#allocation4 + $0x1a8] ss:$16 sps:$4 sm:$0xff]  }
 0x145   :  { %v4514_v49 = vld [vmem:[#allocation4 + $0x188] ss:$16 sps:$4 sm:$0xff]  }
 0x146   :  { %2640 = vmatpush2.bf16.msra.mxu0 %v4457_v16  ;;  %v4492_v16 = vld [vmem:[#allocation4 + $0xc] ss:$16 sps:$4 sm:$0xff]  }
 0x147   :  { %2641 = vmatprep.subr.bf16.mxu0 %v4462_v39  ;;  %2681 = vmatpush2.bf16.msra.mxu1 %v4553_v52  ;;  %v4490_v39 = vld [vmem:[#allocation4 + $0x8] ss:$16 sps:$4 sm:$0xff]  }
 0x148   :  { %2682 = vmatprep.subr.bf16.mxu1 %v4558_v54  ;;  %v4520_v52 = vld [vmem:[#allocation4 + $0x168] ss:$16 sps:$4 sm:$0xff]  }
 0x149   :  { %v4526_v54 = vld [vmem:[#allocation4 + $0x148] ss:$16 sps:$4 sm:$0xff]  }
 0x14a   :  { %2642 = vmatpush2.bf16.msra.mxu0 %v4460_v41  ;;  %v4498_v41 = vld [vmem:[#allocation4 + $0x1ec] ss:$16 sps:$4 sm:$0xff]  }
 0x14b   :  { %2643 = vmatprep.subr.bf16.mxu0 %v4465_v43  ;;  %2683 = vmatpush2.bf16.msra.mxu1 %v4556_v55  ;;  %v4504_v43 = vld [vmem:[#allocation4 + $0x1cc] ss:$16 sps:$4 sm:$0xff]  }
 0x14c   :  { %2684 = vmatprep.subr.bf16.mxu1 %v4561_v58  ;;  %v4534_v55 = vld [vmem:[#allocation4 + $0x12c] ss:$16 sps:$4 sm:$0xff]  }
 0x14e   :  { %2644 = vmatpush2.bf16.msra.mxu0 %v4463_v45  ;;  %v4510_v45 = vld [vmem:[#allocation4 + $0x1ac] ss:$16 sps:$4 sm:$0xff]  }
 0x14f   :  { %2645 = vmatprep.subr.bf16.mxu0 %v4468_v48  ;;  %2685 = vmatpush2.bf16.msra.mxu1 %v4559_v59  ;;  %v4516_v48 = vld [vmem:[#allocation4 + $0x18c] ss:$16 sps:$4 sm:$0xff]  }
 0x150   :  { %2686 = vmatprep.subr.bf16.mxu1 %v4564_v15  ;;  %v4540_v59 = vld [vmem:[#allocation4 + $0x10c] ss:$16 sps:$4 sm:$0xff]  }
 0x152   :  { %2646 = vmatpush2.bf16.msra.mxu0 %v4466_v50  ;;  %v4522_v50 = vld [vmem:[#allocation4 + $0x16c] ss:$16 sps:$4 sm:$0xff]  }
 0x153   :  { %2697 = vmatprep.subr.bf16.mxu0 %v4471_v53  ;;  %2687 = vmatpush2.bf16.msra.mxu1 %v4562_v62  ;;  %v4528_v53 = vld [vmem:[#allocation4 + $0x14c] ss:$16 sps:$4 sm:$0xff]   ;;  %v4613_v62 = vld [vmem:[#allocation6 + $0x70] ss:$8 sps:$4 sm:$0xff]  }
 0x154   :  { %2738 = vmatprep.subr.bf16.mxu1 %v4567_v47  ;;  %v4615_v47 = vld [vmem:[#allocation6 + $0x74] ss:$8 sps:$4 sm:$0xff]  }
 0x156   :  { %v1646_v56 = vpop.f32.mrf.mxu1 }
 0x158   :  { %v1648_v57 = vpop.f32.mrf.mxu1 }
 0x15a   :  { %v1650_v60 = vpop.f32.mrf.mxu1 }
 0x15c   :  { %v1651_v61 = vpop.f32.mrf.mxu1 }
 0x15d   :  { %v4538_v61 = vld [vmem:[#allocation4 + $0x108] ss:$16 sps:$4 sm:$0xff]  }
 0x175   :  { %v1605_v9 = vpop.f32.mrf.mxu0 }
 0x176   :  { %v1606_v11 = vadd.f32 %v1605_v9, %v1565_v8  ;;  %v335_v8 = vrot.slane %v4968_v1, %v334_v3  ;;  %v4619_v9 = vld [vmem:[#allocation6 + $0x50] ss:$8 sps:$4 sm:$0xff]  }
 0x177   :  { %v1607_v12 = vpop.f32.mrf.mxu0 }
 0x178   :  { %v1647_v13 = vadd.f32 %v1646_v56, %v1606_v11  ;;  %v1608_v14 = vadd.f32 %v1607_v12, %v1567_v10  ;;  %v4624_v10 = vld [vmem:[#allocation6 + $0x44] ss:$8 sps:$4 sm:$0xff]   ;;  %v339_v11 = vrot.slane %v4968_v1, %v338_v5 }
 0x179   :  { %v1609_v17 = vpop.f32.mrf.mxu0 }
 0x17a   :  { %v1649_v20 = vadd.f32 %v1648_v57, %v1608_v14  ;;  %v1817_v23 = vmax.f32 %v1647_v13, 0.0  ;;  %v4532_v57 = vld [vmem:[#allocation4 + $0x128] ss:$16 sps:$4 sm:$0xff]   ;;  %v4627_v14 = vld [vmem:[#allocation6 + $0x34] ss:$8 sps:$4 sm:$0xff]  }
 0x17b   :  { %v1610_v24 = vpop.f32.mrf.mxu0  ;;  %v4622_v13 = vld [vmem:[#allocation6 + $0x40] ss:$8 sps:$4 sm:$0xff]  }
 0x17c   :  { %v1818_v25 = vmax.f32 %v1649_v20, 0.0  ;;  %v4981_v28 = vpack.c.bf16 %v1817_v23, %v1817_v23 }
 0x17e   :  { %v1822_v26 = vpack.c.bf16 %v1818_v25, %v1818_v25 }
 0x180   :  { %2647 = vmatprep.mubr.bf16.mxu0 %v1822_v26 }
 0x181   :  { %2648 = vmatmul.mubr.bf16.vlgmr.msra.gmra.mxu0 %v4981_v28 }
 0x182   :  { %2698 = vmatpush1.bf16.msra.mxu0 %v4469_v27  ;;  %2729 = vmatprep.mubr.bf16.mxu0 %v1822_v26  ;;  %v4625_v27 = vld [vmem:[#allocation6 + $0x30] ss:$8 sps:$4 sm:$0xff]  }
 0x183   :  { %2699 = vmatprep.subr.bf16.mxu0 %v4474_v18 }
 0x186   :  { %2700 = vmatpush1.bf16.msra.mxu0 %v4472_v19  ;;  %v4630_v19 = vld [vmem:[#allocation6 + $0x24] ss:$8 sps:$4 sm:$0xff]  }
 0x187   :  { %2701 = vmatprep.subr.bf16.mxu0 %v4477_v21 }
 0x18a   :  { %2702 = vmatpush1.bf16.msra.mxu0 %v4475_v22 }
 0x18b   :  { %2703 = vmatprep.subr.bf16.mxu0 %v4480_v29 }
 0x18e   :  { %2704 = vmatpush1.bf16.msra.mxu0 %v4478_v30 }
 0x18f   :  { %2705 = vmatprep.subr.bf16.mxu0 %v4483_v31  ;;  %v4628_v31 = vld [vmem:[#allocation6 + $0x20] ss:$8 sps:$4 sm:$0xff]  }
 0x192   :  { %2706 = vmatpush1.bf16.msra.mxu0 %v4481_v32 }
 0x193   :  { %2707 = vmatprep.subr.bf16.mxu0 %v4486_v33 }
 0x196   :  { %v4984_v34 = vpop.f32.mrf.mxu1  ;;  %2708 = vmatpush1.bf16.msra.mxu0 %v4484_v7 }
 0x197   :  { %2709 = vmatprep.subr.bf16.mxu0 %v4489_v51  ;;  %v1688_v12 = vadd.f32 %v4984_v34, %v335_v8  ;;  %v4603_v8 = vld [vmem:[#allocation4 + $0x36c] ss:$16 sps:$4 sm:$0xff]  }
 0x198   :  { %v4986_v37 = vpop.f32.mrf.mxu1 }
 0x199   :  { %v1690_v17 = vadd.f32 %v4986_v37, %v339_v11  ;;  %v4645_v11 = vld [vmem:[#allocation6 + $0xd4] ss:$8 sps:$4 sm:$0xff]  }
 0x19a   :  { %v1691_v38 = vpop.f32.mrf.mxu1  ;;  %2710 = vmatpush1.bf16.msra.mxu0 %v4487_v36  ;;  %v4565_v36 = vld [vmem:[#allocation4 + $0x2e8] ss:$16 sps:$4 sm:$0xff]  }
 0x19b   :  { %2711 = vmatprep.subr.bf16.mxu0 %v4492_v16  ;;  %v4570_v16 = vld [vmem:[#allocation4 + $0x2cc] ss:$16 sps:$4 sm:$0xff]   ;;  %v4568_v38 = vld [vmem:[#allocation4 + $0x2c8] ss:$16 sps:$4 sm:$0xff]  }
 0x19c   :  { %v1692_v40 = vpop.f32.mrf.mxu1 }
 0x19d   :  { %v4571_v40 = vld [vmem:[#allocation4 + $0x2a8] ss:$16 sps:$4 sm:$0xff]  }
 0x19e   :  { %2712 = vmatpush1.bf16.msra.mxu0 %v4490_v39  ;;  %v4573_v39 = vld [vmem:[#allocation4 + $0x2ac] ss:$16 sps:$4 sm:$0xff]  }
 0x19f   :  { %2713 = vmatprep.subr.bf16.mxu0 %v4498_v41  ;;  %v4576_v41 = vld [vmem:[#allocation4 + $0x28c] ss:$16 sps:$4 sm:$0xff]  }
 0x1a2   :  { %2714 = vmatpush2.bf16.msra.mxu0 %v4496_v42  ;;  %v4574_v42 = vld [vmem:[#allocation4 + $0x288] ss:$16 sps:$4 sm:$0xff]  }
 0x1a3   :  { %2715 = vmatprep.subr.bf16.mxu0 %v4504_v43  ;;  %v4579_v43 = vld [vmem:[#allocation4 + $0x26c] ss:$16 sps:$4 sm:$0xff]  }
 0x1a6   :  { %2716 = vmatpush2.bf16.msra.mxu0 %v4502_v44  ;;  %v4577_v44 = vld [vmem:[#allocation4 + $0x268] ss:$16 sps:$4 sm:$0xff]  }
 0x1a7   :  { %2717 = vmatprep.subr.bf16.mxu0 %v4510_v45  ;;  %v4582_v45 = vld [vmem:[#allocation4 + $0x24c] ss:$16 sps:$4 sm:$0xff]  }
 0x1aa   :  { %2718 = vmatpush2.bf16.msra.mxu0 %v4508_v46  ;;  %v4580_v46 = vld [vmem:[#allocation4 + $0x248] ss:$16 sps:$4 sm:$0xff]  }
 0x1ab   :  { %2719 = vmatprep.subr.bf16.mxu0 %v4516_v48  ;;  %v4585_v48 = vld [vmem:[#allocation4 + $0x22c] ss:$16 sps:$4 sm:$0xff]  }
 0x1ae   :  { %2720 = vmatpush2.bf16.msra.mxu0 %v4514_v49  ;;  %v4583_v49 = vld [vmem:[#allocation4 + $0x228] ss:$16 sps:$4 sm:$0xff]  }
 0x1af   :  { %2721 = vmatprep.subr.bf16.mxu0 %v4522_v50  ;;  %v4588_v50 = vld [vmem:[#allocation4 + $0x20c] ss:$16 sps:$4 sm:$0xff]  }
 0x1b2   :  { %2722 = vmatpush2.bf16.msra.mxu0 %v4520_v52  ;;  %v4586_v52 = vld [vmem:[#allocation4 + $0x208] ss:$16 sps:$4 sm:$0xff]  }
 0x1b3   :  { %2723 = vmatprep.subr.bf16.mxu0 %v4528_v53  ;;  %v4591_v53 = vld [vmem:[#allocation4 + $0x3ec] ss:$16 sps:$4 sm:$0xff]  }
 0x1b5   :  { %v1728_v56 = vpop.f32.mrf.mxu0 }
 0x1b6   :  { %2724 = vmatpush2.bf16.msra.mxu0 %v4526_v54  ;;  %v1729_v20 = vadd.f32 %v1728_v56, %v1688_v12  ;;  %v4589_v54 = vld [vmem:[#allocation4 + $0x3e8] ss:$16 sps:$4 sm:$0xff]   ;;  %v4606_v12 = vld [vmem:[#allocation4 + $0x34c] ss:$16 sps:$4 sm:$0xff]  }
 0x1b7   :  { %v1730_v58 = vpop.f32.mrf.mxu0  ;;  %2725 = vmatprep.subr.bf16.mxu0 %v4534_v55  ;;  %v4594_v55 = vld [vmem:[#allocation4 + $0x3cc] ss:$16 sps:$4 sm:$0xff]   ;;  %v4592_v56 = vld [vmem:[#allocation4 + $0x3c8] ss:$16 sps:$4 sm:$0xff]  }
 0x1b8   :  { %v1731_v25 = vadd.f32 %v1730_v58, %v1690_v17  ;;  %v4597_v58 = vld [vmem:[#allocation4 + $0x3ac] ss:$16 sps:$4 sm:$0xff]  }
 0x1b9   :  { %v1732_v60 = vpop.f32.mrf.mxu0  ;;  %v4648_v17 = vld [vmem:[#allocation6 + $0xc4] ss:$8 sps:$4 sm:$0xff]  }
 0x1ba   :  { %2726 = vmatpush2.bf16.msra.mxu0 %v4532_v57  ;;  %v4633_v57 = vld [vmem:[#allocation6 + $0x14] ss:$8 sps:$4 sm:$0xff]   ;;  %v4595_v60 = vld [vmem:[#allocation4 + $0x3a8] ss:$16 sps:$4 sm:$0xff]  }
 0x1bb   :  { %v1733_v15 = vpop.f32.mrf.mxu0  ;;  %2727 = vmatprep.subr.bf16.mxu0 %v4540_v59  ;;  %v4631_v59 = vld [vmem:[#allocation6 + $0x10] ss:$8 sps:$4 sm:$0xff]  }
 0x1bc   :  { %v4600_v15 = vld [vmem:[#allocation4 + $0x38c] ss:$16 sps:$4 sm:$0xff]  }
 0x1be   :  { %2728 = vmatpush2.bf16.msra.mxu0 %v4538_v61  ;;  %v4636_v61 = vld [vmem:[#allocation6 + $0x4] ss:$8 sps:$4 sm:$0xff]  }
 0x1bf   :  { %3183 = vmatprep.subr.bf16.mxu0 %v4615_v47  ;;  %v4639_v47 = vld [vmem:[#allocation6 + $0xf4] ss:$8 sps:$4 sm:$0xff]  }
 0x1c1   :  { %2730 = vmatmul.mubr.bf16.vlgmr.msra.gmra.mxu0 %v4981_v28 }
 0x1c2   :  { %3184 = vmatpush1.bf16.msra.mxu0 %v4613_v62  ;;  %v4634_v62 = vld [vmem:[#allocation6] ss:$8 sps:$4 sm:$0xff]  }
 0x1c3   :  { %3185 = vmatprep.subr.bf16.mxu0 %v4618_v6  ;;  %v4637_v6 = vld [vmem:[#allocation6 + $0xf0] ss:$8 sps:$4 sm:$0xff]  }
 0x1c6   :  { %3186 = vmatpush1.bf16.msra.mxu0 %v4616_v4  ;;  %v4598_v4 = vld [vmem:[#allocation4 + $0x388] ss:$16 sps:$4 sm:$0xff]  }
 0x1c7   :  { %3187 = vmatprep.subr.bf16.mxu0 %v4621_v35  ;;  %v4642_v35 = vld [vmem:[#allocation6 + $0xe4] ss:$8 sps:$4 sm:$0xff]  }
 0x1ca   :  { %3188 = vmatpush1.bf16.msra.mxu0 %v4619_v9  ;;  %v4640_v9 = vld [vmem:[#allocation6 + $0xe0] ss:$8 sps:$4 sm:$0xff]  }
 0x1cb   :  { %3189 = vmatprep.subr.bf16.mxu0 %v4624_v10  ;;  %v4601_v10 = vld [vmem:[#allocation4 + $0x368] ss:$16 sps:$4 sm:$0xff]  }
 0x1ce   :  { %3190 = vmatpush1.bf16.msra.mxu0 %v4622_v13  ;;  %v4643_v13 = vld [vmem:[#allocation6 + $0xd0] ss:$8 sps:$4 sm:$0xff]  }
 0x1cf   :  { %3191 = vmatprep.subr.bf16.mxu0 %v4627_v14  ;;  %v4604_v14 = vld [vmem:[#allocation4 + $0x348] ss:$16 sps:$4 sm:$0xff]  }
 0x1d2   :  { %3192 = vmatpush1.bf16.msra.mxu0 %v4625_v27  ;;  %v4649_v27 = vld [vmem:[#allocation6 + $0xb0] ss:$8 sps:$4 sm:$0xff]  }
 0x1d3   :  { %3193 = vmatprep.subr.bf16.mxu0 %v4630_v19  ;;  %v4652_v19 = vld [vmem:[#allocation6 + $0xa0] ss:$8 sps:$4 sm:$0xff]  }
 0x1d5   :  { %v1810_v24 = vpop.f32.mrf.mxu0 }
 0x1d6   :  { %v1769_v23 = vpop.f32.mrf.mxu1  ;;  %3194 = vmatpush1.bf16.msra.mxu0 %v4628_v31  ;;  %v4661_v31 = vld [vmem:[#allocation6 + $0x170] ss:$8 sps:$4 sm:$0xff]  }
 0x1d7   :  { %v1770_v26 = vadd.f32 %v1769_v23, %v1729_v20  ;;  %v1812_v18 = vpop.f32.mrf.mxu0  ;;  %3195 = vmatprep.subr.bf16.mxu0 %v4633_v57  ;;  %v4609_v20 = vld [vmem:[#allocation4 + $0x32c] ss:$16 sps:$4 sm:$0xff]   ;;  %v4646_v23 = vld [vmem:[#allocation6 + $0xc0] ss:$8 sps:$4 sm:$0xff]  }
 0x1d8   :  { %v1771_v28 = vpop.f32.mrf.mxu1  ;;  %v4694_v57 = vld [vmem:[#allocation6 + $0x1c0] ss:$8 sps:$4 sm:$0xff]  }
 0x1d9   :  { %v1811_v1 = vadd.f32 %v1810_v24, %v1770_v26  ;;  %v1772_v21 = vadd.f32 %v1771_v28, %v1731_v25  ;;  %v1814_v29 = vpop.f32.mrf.mxu0  ;;  %v4607_v24 = vld [vmem:[#allocation4 + $0x328] ss:$16 sps:$4 sm:$0xff]   ;;  %v4651_v25 = vld [vmem:[#allocation6 + $0xb4] ss:$8 sps:$4 sm:$0xff]  }
 0x1da   :  { %v1773_v22 = vpop.f32.mrf.mxu1  ;;  %3196 = vmatpush1.bf16.msra.mxu0 %v4631_v59  ;;  %v4612_v26 = vld [vmem:[#allocation4 + $0x30c] ss:$16 sps:$4 sm:$0xff]   ;;  %v4610_v28 = vld [vmem:[#allocation4 + $0x308] ss:$16 sps:$4 sm:$0xff]  }
 0x1db   :  { %v1813_v30 = vadd.f32 %v1812_v18, %v1772_v21  ;;  %v1819_v32 = vmax.f32 %v1811_v1, 0.0  ;;  %v1815_v7 = vpop.f32.mrf.mxu0  ;;  %3197 = vmatprep.subr.bf16.mxu0 %v4636_v61  ;;  %v4654_v18 = vld [vmem:[#allocation6 + $0xa4] ss:$8 sps:$4 sm:$0xff]   ;;  %v4657_v1 = vld [vmem:[#allocation6 + $0x94] ss:$8 sps:$4 sm:$0xff]  }
 0x1dc   :  { %v1774_v33 = vpop.f32.mrf.mxu1  ;;  %v4655_v21 = vld [vmem:[#allocation6 + $0x90] ss:$8 sps:$4 sm:$0xff]   ;;  %v4660_v22 = vld [vmem:[#allocation6 + $0x84] ss:$8 sps:$4 sm:$0xff]   ;;  %v4658_v29 = vld [vmem:[#allocation6 + $0x80] ss:$8 sps:$4 sm:$0xff]  }
 0x1dd   :  { %v1820_v51 = vmax.f32 %v1813_v30, 0.0  ;;  %v4999_v37 = vpack.c.bf16 %v1819_v32, %v1819_v32  ;;  %v4663_v30 = vld [vmem:[#allocation6 + $0x174] ss:$8 sps:$4 sm:$0xff]   ;;  %v4666_v32 = vld [vmem:[#allocation6 + $0x164] ss:$8 sps:$4 sm:$0xff]  }
 0x1de   :  { %3198 = vmatpush1.bf16.msra.mxu0 %v4634_v62  ;;  %v4664_v33 = vld [vmem:[#allocation6 + $0x160] ss:$8 sps:$4 sm:$0xff]   ;;  %v4669_v7 = vld [vmem:[#allocation6 + $0x154] ss:$8 sps:$4 sm:$0xff]   ;;  %v4697_v59 = vld [vmem:[#allocation6 + $0x1b0] ss:$8 sps:$4 sm:$0xff]  }
 0x1df   :  { %v1824_v34 = vpack.c.bf16 %v1820_v51, %v1820_v51  ;;  %3199 = vmatprep.subr.bf16.mxu0 %v4639_v47  ;;  %v4667_v51 = vld [vmem:[#allocation6 + $0x150] ss:$8 sps:$4 sm:$0xff]   ;;  %v4700_v61 = vld [vmem:[#allocation6 + $0x1a0] ss:$8 sps:$4 sm:$0xff]   ;;  %v4708_v47 = vld [vmem:[#allocation6 + $0x184] ss:$8 sps:$4 sm:$0xff]  }
 0x1e0   :  { %v4703_v62 = vld [vmem:[#allocation6 + $0x190] ss:$8 sps:$4 sm:$0xff]  }
 0x1e1   :  { %2688 = vmatprep.mubr.bf16.mxu1 %v1824_v34 }
 0x1e2   :  { %2689 = vmatmul.mubr.bf16.vlgmr.msra.gmra.mxu1 %v4999_v37  ;;  %3200 = vmatpush2.bf16.msra.mxu0 %v4637_v6  ;;  %v4706_v6 = vld [vmem:[#allocation6 + $0x180] ss:$8 sps:$4 sm:$0xff]  }
 0x1e3   :  { %2739 = vmatpush1.bf16.msra.mxu1 %v4565_v36  ;;  %2770 = vmatprep.mubr.bf16.mxu1 %v1824_v34  ;;  %v4672_v34 = vld [vmem:[#allocation6 + $0x144] ss:$8 sps:$4 sm:$0xff]   ;;  %v4670_v36 = vld [vmem:[#allocation6 + $0x140] ss:$8 sps:$4 sm:$0xff]  }
 0x1e4   :  { %2740 = vmatprep.subr.bf16.mxu1 %v4570_v16  ;;  %3201 = vmatprep.subr.bf16.mxu0 %v4642_v35  ;;  %v4673_v16 = vld [vmem:[#allocation6 + $0x130] ss:$8 sps:$4 sm:$0xff]  }
 0x1e6   :  { %3202 = vmatpush2.bf16.msra.mxu0 %v4640_v9 }
 0x1e7   :  { %2741 = vmatpush1.bf16.msra.mxu1 %v4568_v38  ;;  %3203 = vmatprep.subr.bf16.mxu0 %v4645_v11  ;;  %v4678_v38 = vld [vmem:[#allocation6 + $0x124] ss:$8 sps:$4 sm:$0xff]  }
 0x1e8   :  { %2742 = vmatprep.subr.bf16.mxu1 %v4573_v39  ;;  %v4676_v39 = vld [vmem:[#allocation6 + $0x120] ss:$8 sps:$4 sm:$0xff]  }
 0x1ea   :  { %3204 = vmatpush2.bf16.msra.mxu0 %v4643_v13 }
 0x1eb   :  { %2743 = vmatpush1.bf16.msra.mxu1 %v4571_v40  ;;  %3205 = vmatprep.subr.bf16.mxu0 %v4648_v17  ;;  %v4681_v40 = vld [vmem:[#allocation6 + $0x114] ss:$8 sps:$4 sm:$0xff]  }
 0x1ec   :  { %2744 = vmatprep.subr.bf16.mxu1 %v4576_v41  ;;  %v4679_v41 = vld [vmem:[#allocation6 + $0x110] ss:$8 sps:$4 sm:$0xff]  }
 0x1ee   :  { %3206 = vmatpush2.bf16.msra.mxu0 %v4646_v23 }
 0x1ef   :  { %2745 = vmatpush1.bf16.msra.mxu1 %v4574_v42  ;;  %3207 = vmatprep.subr.bf16.mxu0 %v4651_v25 }
 0x1f0   :  { %2746 = vmatprep.subr.bf16.mxu1 %v4579_v43  ;;  %v4684_v43 = vld [vmem:[#allocation6 + $0x104] ss:$8 sps:$4 sm:$0xff]  }
 0x1f2   :  { %3208 = vmatpush2.bf16.msra.mxu0 %v4649_v27 }
 0x1f3   :  { %2747 = vmatpush1.bf16.msra.mxu1 %v4577_v44  ;;  %3209 = vmatprep.subr.bf16.mxu0 %v4654_v18 }
 0x1f4   :  { %2748 = vmatprep.subr.bf16.mxu1 %v4582_v45  ;;  %v4682_v45 = vld [vmem:[#allocation6 + $0x100] ss:$8 sps:$4 sm:$0xff]  }
 0x1f6   :  { %3210 = vmatpush2.bf16.msra.mxu0 %v4652_v19 }
 0x1f7   :  { %2749 = vmatpush1.bf16.msra.mxu1 %v4580_v46  ;;  %3211 = vmatprep.subr.bf16.mxu0 %v4657_v1 }
 0x1f8   :  { %2750 = vmatprep.subr.bf16.mxu1 %v4585_v48  ;;  %v4687_v48 = vld [vmem:[#allocation6 + $0x1f4] ss:$8 sps:$4 sm:$0xff]  }
 0x1fa   :  { %3212 = vmatpush2.bf16.msra.mxu0 %v4655_v21 }
 0x1fb   :  { %2751 = vmatpush1.bf16.msra.mxu1 %v4583_v49  ;;  %3213 = vmatprep.subr.bf16.mxu0 %v4660_v22 }
 0x1fc   :  { %2752 = vmatprep.subr.bf16.mxu1 %v4588_v50  ;;  %v4685_v50 = vld [vmem:[#allocation6 + $0x1f0] ss:$8 sps:$4 sm:$0xff]  }
 0x1fe   :  { %3214 = vmatpush2.bf16.msra.mxu0 %v4658_v29 }
 0x1ff   :  { %2753 = vmatpush1.bf16.msra.mxu1 %v4586_v52  ;;  %v4690_v52 = vld [vmem:[#allocation6 + $0x1e4] ss:$8 sps:$4 sm:$0xff]  }
 0x200   :  { %2754 = vmatprep.subr.bf16.mxu1 %v4591_v53  ;;  %v4688_v53 = vld [vmem:[#allocation6 + $0x1e0] ss:$8 sps:$4 sm:$0xff]  }
 0x203   :  { %2755 = vmatpush2.bf16.msra.mxu1 %v4589_v54  ;;  %v4693_v54 = vld [vmem:[#allocation6 + $0x1d4] ss:$8 sps:$4 sm:$0xff]  }
 0x204   :  { %2756 = vmatprep.subr.bf16.mxu1 %v4594_v55  ;;  %v4691_v55 = vld [vmem:[#allocation6 + $0x1d0] ss:$8 sps:$4 sm:$0xff]  }
 0x207   :  { %2757 = vmatpush2.bf16.msra.mxu1 %v4592_v56  ;;  %v4696_v56 = vld [vmem:[#allocation6 + $0x1c4] ss:$8 sps:$4 sm:$0xff]  }
 0x208   :  { %2758 = vmatprep.subr.bf16.mxu1 %v4597_v58  ;;  %v4699_v58 = vld [vmem:[#allocation6 + $0x1b4] ss:$8 sps:$4 sm:$0xff]  }
 0x20b   :  { %2759 = vmatpush2.bf16.msra.mxu1 %v4595_v60  ;;  %v4702_v60 = vld [vmem:[#allocation6 + $0x1a4] ss:$8 sps:$4 sm:$0xff]  }
 0x20c   :  { %2760 = vmatprep.subr.bf16.mxu1 %v4600_v15  ;;  %v4705_v15 = vld [vmem:[#allocation6 + $0x194] ss:$8 sps:$4 sm:$0xff]  }
 0x20f   :  { %2761 = vmatpush2.bf16.msra.mxu1 %v4598_v4 }
 0x210   :  { %2762 = vmatprep.subr.bf16.mxu1 %v4603_v8 }
 0x213   :  { %2763 = vmatpush2.bf16.msra.mxu1 %v4601_v10  ;;  %v1953_v10 = vld [vmem:[%s5078_s4] sm:$0xf] }
 0x214   :  { %2764 = vmatprep.subr.bf16.mxu1 %v4606_v12  ;;  %v1958_v11 = vrot.slane %v1953_v10, %v4963_v0  ;;  %v1962_v12 = vrot.slane %v1953_v10, %v4971_v2  ;;  %v1966_v1 = vrot.slane %v1953_v10, %v334_v3  ;;  %v1970_v21 = vrot.slane %v1953_v10, %v338_v5  ;;  %v4709_v3 = vld [vmem:[%s5081_s7 + $0x78] sm:$0xff]   ;;  %v4711_v5 = vld [vmem:[%s5081_s7 + $0x70] sm:$0xff]  }
 0x215   :  { %4014 = vmatprep.subr.bf16.mxu0 %v4709_v3 }
 0x217   :  { %2765 = vmatpush2.bf16.msra.mxu1 %v4604_v14 }
 0x218   :  { %2766 = vmatprep.subr.bf16.mxu1 %v4609_v20 }
 0x21b   :  { %2767 = vmatpush2.bf16.msra.mxu1 %v4607_v24 }
 0x21c   :  { %2768 = vmatprep.subr.bf16.mxu1 %v4612_v26 }
 0x21f   :  { %2769 = vmatpush2.bf16.msra.mxu1 %v4610_v28 }
 0x220   :  { %3224 = vmatprep.subr.bf16.mxu1 %v4663_v30 }
 0x222   :  { %2771 = vmatmul.mubr.bf16.vlgmr.msra.gmra.mxu1 %v4999_v37  ;;  %v4675_v37 = vld [vmem:[#allocation6 + $0x134] ss:$8 sps:$4 sm:$0xff]  }
 0x223   :  { %3225 = vmatpush1.bf16.msra.mxu1 %v4661_v31 }
 0x224   :  { %3226 = vmatprep.subr.bf16.mxu1 %v4666_v32 }
 0x227   :  { %3227 = vmatpush1.bf16.msra.mxu1 %v4664_v33 }
 0x228   :  { %3228 = vmatprep.subr.bf16.mxu1 %v4669_v7 }
 0x22b   :  { %3229 = vmatpush1.bf16.msra.mxu1 %v4667_v51 }
 0x22c   :  { %3230 = vmatprep.subr.bf16.mxu1 %v4672_v34 }
 0x22f   :  { %3231 = vmatpush1.bf16.msra.mxu1 %v4670_v36 }
 0x230   :  { %3232 = vmatprep.subr.bf16.mxu1 %v4675_v37 }
 0x233   :  { %3233 = vmatpush1.bf16.msra.mxu1 %v4673_v16 }
 0x234   :  { %3234 = vmatprep.subr.bf16.mxu1 %v4678_v38  ;;  %v4712_v38 = vld [vmem:[%s5081_s7 + $0x30] sm:$0xff]  }
 0x237   :  { %3235 = vmatpush1.bf16.msra.mxu1 %v4676_v39  ;;  %v4713_v39 = vld [vmem:[%s5081_s7 + $0x68] sm:$0xff]  }
 0x238   :  { %3236 = vmatprep.subr.bf16.mxu1 %v4681_v40  ;;  %v4714_v40 = vld [vmem:[%s5081_s7 + $0x28] sm:$0xff]  }
 0x23b   :  { %3237 = vmatpush1.bf16.msra.mxu1 %v4679_v41  ;;  %v4715_v41 = vld [vmem:[%s5081_s7 + $0x60] sm:$0xff]  }
 0x23c   :  { %3238 = vmatprep.subr.bf16.mxu1 %v4684_v43  ;;  %v4717_v43 = vld [vmem:[%s5081_s7 + $0x58] sm:$0xff]  }
 0x23f   :  { %3239 = vmatpush1.bf16.msra.mxu1 %v4682_v45  ;;  %v4719_v45 = vld [vmem:[%s5081_s7 + $0x50] sm:$0xff]  }
 0x240   :  { %3240 = vmatprep.subr.bf16.mxu1 %v4687_v48  ;;  %v4721_v48 = vld [vmem:[%s5081_s7 + $0x48] sm:$0xff]  }
 0x241   :  { %v2649_v42 = vpop.f32.mrf.mxu0 }
 0x242   :  { %v2650_v13 = vadd.f32 %v2649_v42, %v1958_v11  ;;  %v4716_v42 = vld [vmem:[%s5081_s7 + $0x20] sm:$0xff]  }
 0x243   :  { %v2651_v44 = vpop.f32.mrf.mxu0  ;;  %3241 = vmatpush2.bf16.msra.mxu1 %v4685_v50  ;;  %v4723_v50 = vld [vmem:[%s5081_s7 + $0x40] sm:$0xff]  }
 0x244   :  { %3242 = vmatprep.subr.bf16.mxu1 %v4690_v52  ;;  %v2652_v17 = vadd.f32 %v2651_v44, %v1962_v12  ;;  %v4718_v44 = vld [vmem:[%s5081_s7 + $0x18] sm:$0xff]   ;;  %v4724_v52 = vld [vmem:[%s5081_s7] sm:$0xff]  }
 0x245   :  { %v2653_v46 = vpop.f32.mrf.mxu0 }
 0x246   :  { %v4720_v46 = vld [vmem:[%s5081_s7 + $0x10] sm:$0xff]  }
 0x247   :  { %v2654_v49 = vpop.f32.mrf.mxu0  ;;  %3243 = vmatpush2.bf16.msra.mxu1 %v4688_v53  ;;  %v4725_v53 = vld [vmem:[#allocation7 + $0x38] sm:$0xff]  }
 0x248   :  { %3244 = vmatprep.subr.bf16.mxu1 %v4693_v54  ;;  %v4722_v49 = vld [vmem:[%s5081_s7 + $0x8] sm:$0xff]   ;;  %v4831_v54 = vmov 0.0  }
 0x24b   :  { %3245 = vmatpush2.bf16.msra.mxu1 %v4691_v55  ;;  %v4726_v55 = vld [vmem:[#allocation7 + $0x30] sm:$0xff]  }
 0x24c   :  { %3246 = vmatprep.subr.bf16.mxu1 %v4696_v56  ;;  %v4727_v56 = vld [vmem:[#allocation7 + $0x28] sm:$0xff]  }
 0x24f   :  { %3247 = vmatpush2.bf16.msra.mxu1 %v4694_v57  ;;  %v4728_v57 = vld [vmem:[#allocation7 + $0x20] sm:$0xff]  }
 0x250   :  { %3248 = vmatprep.subr.bf16.mxu1 %v4699_v58  ;;  %v4729_v58 = vld [vmem:[#allocation7 + $0x18] sm:$0xff]  }
 0x253   :  { %3249 = vmatpush2.bf16.msra.mxu1 %v4697_v59 }
 0x254   :  { %3250 = vmatprep.subr.bf16.mxu1 %v4702_v60 }
 0x257   :  { %3251 = vmatpush2.bf16.msra.mxu1 %v4700_v61 }
 0x258   :  { %3252 = vmatprep.subr.bf16.mxu1 %v4705_v15 }
 0x25b   :  { %3253 = vmatpush2.bf16.msra.mxu1 %v4703_v62  ;;  %v2851_v62 = vld [vmem:[%s5080_s6] sm:$0x3] }
 0x25c   :  { %3254 = vmatprep.subr.bf16.mxu1 %v4708_v47  ;;  %v2856_v47 = vrot.slane %v2851_v62, %v4963_v0  ;;  %v4731_v0 = vld [vmem:[#allocation7 + $0x8] sm:$0xff]  }
 0x25f   :  { %3255 = vmatpush2.bf16.msra.mxu1 %v4706_v6  ;;  %v2860_v6 = vrot.slane %v2851_v62, %v4971_v2  ;;  %v4732_v2 = vld [vmem:[#allocation7] sm:$0xff]  }
 0x260   :  { %4045 = vmatprep.subr.bf16.mxu1 %v4831_v54 }
 0x281   :  { %v2731_v4 = vpop.f32.mrf.mxu0 }
 0x282   :  { %v2732_v22 = vadd.f32 %v2731_v4, %v1966_v1 }
 0x283   :  { %v2733_v35 = vpop.f32.mrf.mxu0 }
 0x284   :  { %v2734_v30 = vadd.f32 %v2733_v35, %v1970_v21 }
 0x285   :  { %v2735_v8 = vpop.f32.mrf.mxu0 }
 0x287   :  { %v2736_v9 = vpop.f32.mrf.mxu0 }
 0x2a2   :  { %v2690_v14 = vpop.f32.mrf.mxu1 }
 0x2a3   :  { %v2691_v20 = vadd.f32 %v2690_v14, %v2650_v13 }
 0x2a4   :  { %v2692_v23 = vpop.f32.mrf.mxu1 }
 0x2a5   :  { %v2693_v24 = vadd.f32 %v2692_v23, %v2652_v17  ;;  %v2779_v25 = vmax.f32 %v2691_v20, 0.0 }
 0x2a6   :  { %v2694_v26 = vpop.f32.mrf.mxu1 }
 0x2a7   :  { %v2780_v27 = vmax.f32 %v2693_v24, 0.0  ;;  %v2783_v19 = vpack.c.bf16 %v2779_v25, %v2779_v25  ;;  %v4730_v24 = vld [vmem:[#allocation7 + $0x10] sm:$0xff]   ;;  %v3988_v26 = vld [vmem:[%s5082_s8] ss:$0 sm:$0xff] }
 0x2a8   :  { %v2695_v28 = vpop.f32.mrf.mxu1 }
 0x2a9   :  { %v2784_v18 = vpack.c.bf16 %v2780_v27, %v2780_v27 }
 0x2ab   :  { %3215 = vmatprep.mubr.bf16.mxu0 %v2784_v18 }
 0x2ac   :  { %3216 = vmatmul.mubr.bf16.vlgmr.msra.gmra.mxu0 %v2783_v19 }
 0x2ad   :  { %4015 = vmatpush3.bf16.msra.mxu0 %v4710_v63 }
 0x2ae   :  { %4016 = vmatprep.subr.bf16.mxu0 %v4711_v5 }
 0x2b1   :  { %4017 = vmatpush3.bf16.msra.mxu0 %v4712_v38 }
 0x2b2   :  { %4018 = vmatprep.subr.bf16.mxu0 %v4713_v39 }
 0x2b5   :  { %4019 = vmatpush3.bf16.msra.mxu0 %v4714_v40 }
 0x2b6   :  { %4020 = vmatprep.subr.bf16.mxu0 %v4715_v41 }
 0x2b9   :  { %4021 = vmatpush3.bf16.msra.mxu0 %v4716_v42 }
 0x2ba   :  { %4022 = vmatprep.subr.bf16.mxu0 %v4717_v43 }
 0x2bd   :  { %4023 = vmatpush3.bf16.msra.mxu0 %v4718_v44 }
 0x2be   :  { %4024 = vmatprep.subr.bf16.mxu0 %v4719_v45 }
 0x2c1   :  { %4025 = vmatpush3.bf16.msra.mxu0 %v4720_v46 }
 0x2c2   :  { %4026 = vmatprep.subr.bf16.mxu0 %v4721_v48 }
 0x2c5   :  { %4027 = vmatpush3.bf16.msra.mxu0 %v4722_v49 }
 0x2c6   :  { %4028 = vmatprep.subr.bf16.mxu0 %v4723_v50 }
 0x2c9   :  { %4029 = vmatpush3.bf16.msra.mxu0 %v4724_v52 }
 0x2e2   :  { %v2772_v29 = vpop.f32.mrf.mxu1 }
 0x2e3   :  { %v2773_v31 = vadd.f32 %v2772_v29, %v2732_v22  ;;  %v4005_v29 = vld [vmem:[%s5084_s10] ss:$0 sm:$0xff] }
 0x2e4   :  { %v2774_v32 = vpop.f32.mrf.mxu1 }
 0x2e5   :  { %v2775_v33 = vadd.f32 %v2774_v32, %v2734_v30  ;;  %v2781_v7 = vmax.f32 %v2773_v31, 0.0 }
 0x2e6   :  { %v2776_v51 = vpop.f32.mrf.mxu1 }
 0x2e7   :  { %v2782_v34 = vmax.f32 %v2775_v33, 0.0  ;;  %v2785_v16 = vpack.c.bf16 %v2781_v7, %v2781_v7 }
 0x2e8   :  { %v2777_v36 = vpop.f32.mrf.mxu1 }
 0x2e9   :  { %v2786_v37 = vpack.c.bf16 %v2782_v34, %v2782_v34 }
 0x2eb   :  { %3256 = vmatprep.mubr.bf16.mxu1 %v2786_v37 }
 0x2ec   :  { %3257 = vmatmul.mubr.bf16.vlgmr.msra.gmra.mxu1 %v2785_v16 }
 0x2ed   :  { %4046 = vmatpush3.bf16.msra.mxu1 %v4725_v53  ;;  %4061 = vmatprep.mubr.msk.bf16.mxu1 %vm4832_vm0, %v4831_v54 }
 0x2ee   :  { %4047 = vmatprep.subr.bf16.mxu1 %v4831_v54 }
 0x2f1   :  { %4048 = vmatpush3.bf16.msra.mxu1 %v4726_v55 }
 0x2f2   :  { %4049 = vmatprep.subr.bf16.mxu1 %v4831_v54 }
 0x2f5   :  { %4050 = vmatpush3.bf16.msra.mxu1 %v4727_v56 }
 0x2f6   :  { %4051 = vmatprep.subr.bf16.mxu1 %v4831_v54 }
 0x2f9   :  { %4052 = vmatpush3.bf16.msra.mxu1 %v4728_v57 }
 0x2fa   :  { %4053 = vmatprep.subr.bf16.mxu1 %v4831_v54 }
 0x2fd   :  { %4054 = vmatpush3.bf16.msra.mxu1 %v4729_v58 }
 0x2fe   :  { %4055 = vmatprep.subr.bf16.mxu1 %v4831_v54 }
 0x301   :  { %4056 = vmatpush3.bf16.msra.mxu1 %v4730_v24 }
 0x302   :  { %4057 = vmatprep.subr.bf16.mxu1 %v4831_v54 }
 0x305   :  { %4058 = vmatpush3.bf16.msra.mxu1 %v4731_v0 }
 0x306   :  { %4059 = vmatprep.subr.bf16.mxu1 %v4831_v54 }
 0x309   :  { %4060 = vmatpush3.bf16.msra.mxu1 %v4732_v2 }
 0x36c   :  { %v3217_v59 = vpop.f32.mrf.mxu0 }
 0x36d   :  { %v3218_v4 = vadd.f32 %v3217_v59, %v2856_v47 }
 0x36e   :  { %v3219_v60 = vpop.f32.mrf.mxu0 }
 0x36f   :  { %v3220_v8 = vadd.f32 %v3219_v60, %v2860_v6 }
 0x370   :  { %v3221_v61 = vpop.f32.mrf.mxu0 }
 0x372   :  { %v3222_v15 = vpop.f32.mrf.mxu0 }
 0x3ac   :  { %v3258_v35 = vpop.f32.mrf.mxu1 }
 0x3ad   :  { %v3259_v9 = vadd.f32 %v3258_v35, %v3218_v4 }
 0x3ae   :  { %v3260_v10 = vpop.f32.mrf.mxu1 }
 0x3af   :  { %v3261_v11 = vadd.f32 %v3260_v10, %v3220_v8  ;;  %v3265_v12 = vmax.f32 %v3259_v9, 0.0 }
 0x3b0   :  { %v3262_v13 = vpop.f32.mrf.mxu1 }
 0x3b1   :  { %v3266_v14 = vmax.f32 %v3261_v11, 0.0  ;;  %v3267_v23 = vpack.c.bf16 %v3265_v12, %v3265_v12 }
 0x3b2   :  { %v3263_v17 = vpop.f32.mrf.mxu1 }
 0x3b3   :  { %v3268_v20 = vpack.c.bf16 %v3266_v14, %v3266_v14 }
 0x3b5   :  { %3436 = vmatprep.mubr.bf16.mxu0 %v3268_v20 }
 0x3b6   :  { %3437 = vmatmul.mubr.bf16.vlgmr.msra.gmra.mxu0 %v3267_v23 }
 0x476   :  { %v4030_v25 = vpop.f32.mrf.mxu0 }
 0x478   :  { %v4031_v27 = vpop.f32.mrf.mxu0 }
 0x479   :  { %v4032_v28 = vadd.f32 %v4031_v27, %v4030_v25 }
 0x47a   :  { %v4033_v18 = vpop.f32.mrf.mxu0 }
 0x47b   :  { %v3439_v19 = vadd.f32 %v4032_v28, %v3988_v26 }
 0x47c   :  { %v4034_v1 = vpop.f32.mrf.mxu0 }
 0x47d   :  { %v3444_v21 = vmax.f32 %v3439_v19, 0.0 }
 0x47f   :  { %v3445_v22 = vpack.c.bf16 %v3444_v21, %v3444_v21 }
 0x481   :  { %4062 = vmatmul.mubr.bf16.vlgmr.msra.gmra.mxu1 %v3445_v22 }
 0x541   :  { %v3551_v30 = vpop.f32.mrf.mxu1 }
 0x542   :  { %v3552_v31 = vadd.f32 %v4005_v29, %v3551_v30 }
 0x543   :  { %v4063_v32 = vpop.f32.mrf.mxu1 }
 0x544   :  { %3557 = vst [vmem:[%s5085_s11] sm:$0xff] %v3552_v31 }
 0x545   :  { %v3554_v33 = vpop.f32.mrf.mxu1 }
 0x547   :  { %v4064_v7 = vpop.f32.mrf.mxu1 }
 0x548   :  { %3562 = vsyncpa [#allocation3], 1 }
 0x549   :  { %3563 = vsyncpa [#allocation5], 1 }
 0x54a   :  { %3564 = vsyncpa [#allocation8], 1 }

</bundles_post_ra>
